<compile_context>
chip_gen: v6e
topology: v6e:2x2x1
jax: 0.10.0
libtpu: 0.0.40
codegen_flags: <defaults>
</compile_context>

<pallas_src>
import functools

import jax
import jax.numpy as jnp
from jax.experimental import pallas as pl
from jax.experimental.pallas import tpu as pltpu

D_IN = 28 * 28        # 784 logical input features
D_IN_PAD = 896        # 7 * 128  (lane-aligned K for the first matmul)
D_H1, D_H2, D_H3 = 512, 256, 128
D_OUT = 10
D_OUT_PAD = 128       # lane-dense output width


def _round_up(x, m):
    return (x + m - 1) // m * m


def mlp_kernel(x_ref, w1_ref, b1_ref, w2_ref, b2_ref,
               w3_ref, b3_ref, w4_ref, b4_ref, out_ref):
    # bf16 MXU inputs, f32 accumulation, f32 bias add + ReLU on the VPU.
    x = x_ref[...]                                                   # (TB, 896) bf16

    h1 = jnp.dot(x, w1_ref[...], preferred_element_type=jnp.float32) + b1_ref[...]
    h1 = jnp.maximum(h1, 0.0).astype(jnp.bfloat16)                   # (TB, 512)

    h2 = jnp.dot(h1, w2_ref[...], preferred_element_type=jnp.float32) + b2_ref[...]
    h2 = jnp.maximum(h2, 0.0).astype(jnp.bfloat16)                   # (TB, 256)

    h3 = jnp.dot(h2, w3_ref[...], preferred_element_type=jnp.float32) + b3_ref[...]
    h3 = jnp.maximum(h3, 0.0).astype(jnp.bfloat16)                   # (TB, 128)

    logits = jnp.dot(h3, w4_ref[...], preferred_element_type=jnp.float32) + b4_ref[...]
    out_ref[...] = logits.astype(out_ref.dtype)                      # (TB, 128)


@functools.partial(jax.jit, static_argnames=("tile_b",))
def mymodel_forward(x_nchw, prepared_params, *, tile_b=256):
    """x_nchw: (B, 1, 28, 28) float32. Returns logits (B, 10) float32."""
    B = x_nchw.shape[0]
    w1, b1, w2, b2, w3, b3, w4, b4 = prepared_params

    # Flatten, cast to bf16 early (halves pad/copy bytes), lane-pad features.
    x = x_nchw.reshape(B, D_IN).astype(jnp.bfloat16)

    # Batch tile: big for MXU occupancy, but never larger than the (rounded)
    # batch itself; pad the batch to a multiple of the tile.
    tb = min(tile_b, _round_up(B, 8))
    B_pad = _round_up(B, tb)
    x = jnp.pad(x, ((0, B_pad - B), (0, D_IN_PAD - D_IN)))

    const = lambda i: (0, 0)     # weights/biases: same block every grid step
    grid = (B_pad // tb,)

    flops = 2 * B_pad * (D_IN_PAD * D_H1 + D_H1 * D_H2 + D_H2 * D_H3 + D_H3 * D_OUT_PAD)
    bytes_accessed = (
        x.size * 2
        + (w1.size + w2.size + w3.size + w4.size) * 2
        + (b1.size + b2.size + b3.size + b4.size) * 4
        + B_pad * D_OUT_PAD * 4
    )

    out = pl.pallas_call(
        mlp_kernel,
        out_shape=jax.ShapeDtypeStruct((B_pad, D_OUT_PAD), jnp.float32),
        grid_spec=pltpu.PrefetchScalarGridSpec(
            num_scalar_prefetch=0,
            grid=grid,
            in_specs=[
                pl.BlockSpec((tb, D_IN_PAD), lambda i: (i, 0)),      # x tile
                pl.BlockSpec((D_IN_PAD, D_H1), const),
                pl.BlockSpec((1, D_H1), const),
                pl.BlockSpec((D_H1, D_H2), const),
                pl.BlockSpec((1, D_H2), const),
                pl.BlockSpec((D_H2, D_H3), const),
                pl.BlockSpec((1, D_H3), const),
                pl.BlockSpec((D_H3, D_OUT_PAD), const),
                pl.BlockSpec((1, D_OUT_PAD), const),
            ],
            out_specs=pl.BlockSpec((tb, D_OUT_PAD), lambda i: (i, 0)),
        ),
        compiler_params=pltpu.CompilerParams(
            dimension_semantics=("parallel",),
            vmem_limit_bytes=64 << 20,
        ),
        cost_estimate=pl.CostEstimate(
            flops=flops, transcendentals=0, bytes_accessed=bytes_accessed),
    )(x, w1, b1, w2, b2, w3, b3, w4, b4)

    return out[:B, :D_OUT]


def init_params(key):
    """Logical params (torch.nn.Linear default init), weights as (in, out)."""
    dims = [(D_IN, D_H1), (D_H1, D_H2), (D_H2, D_H3), (D_H3, D_OUT)]
    params = []
    for i, (din, dout) in enumerate(dims):
        kw, kb = jax.random.split(jax.random.fold_in(key, i))
        bound = 1.0 / jnp.sqrt(din)
        w = jax.random.uniform(kw, (din, dout), jnp.float32, -bound, bound)
        b = jax.random.uniform(kb, (1, dout), jnp.float32, -bound, bound)
        params += [w, b]
    return tuple(params)


def prepare_params(params):
    """Pad to lane-aligned shapes and cast weights to bf16 (biases stay f32)."""
    w1, b1, w2, b2, w3, b3, w4, b4 = params
    w1p = jnp.pad(w1, ((0, D_IN_PAD - D_IN), (0, 0))).astype(jnp.bfloat16)
    w4p = jnp.pad(w4, ((0, 0), (0, D_OUT_PAD - D_OUT))).astype(jnp.bfloat16)
    b4p = jnp.pad(b4, ((0, 0), (0, D_OUT_PAD - D_OUT)))
    return (w1p, b1,
            w2.astype(jnp.bfloat16), b2,
            w3.astype(jnp.bfloat16), b3,
            w4p, b4p)


def reference_forward(x_nchw, prepared_params):
    """Plain-JAX reference mirroring the kernel's bf16/f32 numerics."""
    w1, b1, w2, b2, w3, b3, w4, b4 = prepared_params
    B = x_nchw.shape[0]
    x = x_nchw.reshape(B, D_IN).astype(jnp.bfloat16)
    x = jnp.pad(x, ((0, 0), (0, D_IN_PAD - D_IN)))
    h = jnp.maximum(jnp.dot(x, w1, preferred_element_type=jnp.float32) + b1, 0.0)
    h = jnp.maximum(jnp.dot(h.astype(jnp.bfloat16), w2,
                            preferred_element_type=jnp.float32) + b2, 0.0)
    h = jnp.maximum(jnp.dot(h.astype(jnp.bfloat16), w3,
                            preferred_element_type=jnp.float32) + b3, 0.0)
    logits = jnp.dot(h.astype(jnp.bfloat16), w4,
                     preferred_element_type=jnp.float32) + b4
    return logits[:, :D_OUT]


if __name__ == "__main__":
    key = jax.random.PRNGKey(0)
    kx, kp = jax.random.split(key)

    params = prepare_params(init_params(kp))

    # Small deterministic test (single grid step).
    B = 8
    x = jax.random.normal(kx, (B, 1, 28, 28), jnp.float32)   # NCHW like PyTorch
    logits = jax.block_until_ready(mymodel_forward(x, params))
    ref = reference_forward(x, params)
    assert logits.shape == (B, 10)
    assert jnp.allclose(logits, ref, atol=2e-2, rtol=2e-2)

    # Non-multiple batch: exercises batch padding + multi-step parallel grid.
    B2 = 300
    x2 = jax.random.normal(jax.random.fold_in(kx, 1), (B2, 1, 28, 28), jnp.float32)
    logits2 = jax.block_until_ready(mymodel_forward(x2, params))
    ref2 = reference_forward(x2, params)
    assert logits2.shape == (B2, 10)
    assert jnp.allclose(logits2, ref2, atol=2e-2, rtol=2e-2)

    print("KERNEL_OK")
</pallas_src>

<mosaic_0001>
module attributes {stable_mosaic.version = 11 : i64} {
  func.func @mlp_kernel(%arg0: i32, %arg1: memref<8x896xbf16, #tpu.memory_space<vmem>>, %arg2: memref<896x512xbf16, #tpu.memory_space<vmem>>, %arg3: memref<1x512xf32, #tpu.memory_space<vmem>>, %arg4: memref<512x256xbf16, #tpu.memory_space<vmem>>, %arg5: memref<1x256xf32, #tpu.memory_space<vmem>>, %arg6: memref<256x128xbf16, #tpu.memory_space<vmem>>, %arg7: memref<1x128xf32, #tpu.memory_space<vmem>>, %arg8: memref<128x128xbf16, #tpu.memory_space<vmem>>, %arg9: memref<1x128xf32, #tpu.memory_space<vmem>>, %arg10: memref<8x128xf32, #tpu.memory_space<vmem>>) attributes {dimension_semantics = [#tpu.dimension_semantics<parallel>], iteration_bounds = array<i64: 1>, scalar_prefetch = 0 : i64, scratch_operands = 0 : i64, tpu.core_type = #tpu.core_type<tc>, window_params = [{transform_indices = @transform_0, window_bounds = array<i64: 8, 896>}, {pipeline_mode = #tpu.pipeline_mode<synchronous>, transform_indices = @transform_1, window_bounds = array<i64: 896, 512>}, {pipeline_mode = #tpu.pipeline_mode<synchronous>, transform_indices = @transform_2, window_bounds = array<i64: 1, 512>}, {pipeline_mode = #tpu.pipeline_mode<synchronous>, transform_indices = @transform_3, window_bounds = array<i64: 512, 256>}, {pipeline_mode = #tpu.pipeline_mode<synchronous>, transform_indices = @transform_4, window_bounds = array<i64: 1, 256>}, {pipeline_mode = #tpu.pipeline_mode<synchronous>, transform_indices = @transform_5, window_bounds = array<i64: 256, 128>}, {pipeline_mode = #tpu.pipeline_mode<synchronous>, transform_indices = @transform_6, window_bounds = array<i64: 1, 128>}, {pipeline_mode = #tpu.pipeline_mode<synchronous>, transform_indices = @transform_7, window_bounds = array<i64: 128, 128>}, {pipeline_mode = #tpu.pipeline_mode<synchronous>, transform_indices = @transform_8, window_bounds = array<i64: 1, 128>}, {transform_indices = @transform_9, window_bounds = array<i64: 8, 128>}]} {
    %c0 = arith.constant 0 : index
    %c0_0 = arith.constant 0 : index
    %0 = vector.load %arg1[%c0, %c0_0] : memref<8x896xbf16, #tpu.memory_space<vmem>>, vector<8x896xbf16>
    %c0_1 = arith.constant 0 : index
    %c0_2 = arith.constant 0 : index
    %1 = vector.load %arg2[%c0_1, %c0_2] : memref<896x512xbf16, #tpu.memory_space<vmem>>, vector<896x512xbf16>
    %cst = arith.constant dense<0.000000e+00> : vector<8x512xf32>
    %2 = tpu.matmul %0, %1, %cst {dimension_numbers = #tpu.dot_dimension_numbers<[1], [0], [0], [1], [0, 0, 1, 1], [], []>} : vector<8x896xbf16>, vector<896x512xbf16>, vector<8x512xf32> -> vector<8x512xf32>
    %c0_3 = arith.constant 0 : index
    %c0_4 = arith.constant 0 : index
    %3 = vector.load %arg3[%c0_3, %c0_4] : memref<1x512xf32, #tpu.memory_space<vmem>>, vector<1x512xf32>
    %4 = vector.broadcast %3 : vector<1x512xf32> to vector<8x512xf32>
    %5 = arith.addf %2, %4 : vector<8x512xf32>
    %cst_5 = arith.constant 0.000000e+00 : f32
    %6 = vector.broadcast %cst_5 : f32 to vector<8x512xf32>
    %7 = arith.maximumf %5, %6 : vector<8x512xf32>
    %8 = arith.truncf %7 : vector<8x512xf32> to vector<8x512xbf16>
    %c0_6 = arith.constant 0 : index
    %c0_7 = arith.constant 0 : index
    %9 = vector.load %arg4[%c0_6, %c0_7] : memref<512x256xbf16, #tpu.memory_space<vmem>>, vector<512x256xbf16>
    %cst_8 = arith.constant dense<0.000000e+00> : vector<8x256xf32>
    %10 = tpu.matmul %8, %9, %cst_8 {dimension_numbers = #tpu.dot_dimension_numbers<[1], [0], [0], [1], [0, 0, 1, 1], [], []>} : vector<8x512xbf16>, vector<512x256xbf16>, vector<8x256xf32> -> vector<8x256xf32>
    %c0_9 = arith.constant 0 : index
    %c0_10 = arith.constant 0 : index
    %11 = vector.load %arg5[%c0_9, %c0_10] : memref<1x256xf32, #tpu.memory_space<vmem>>, vector<1x256xf32>
    %12 = vector.broadcast %11 : vector<1x256xf32> to vector<8x256xf32>
    %13 = arith.addf %10, %12 : vector<8x256xf32>
    %cst_11 = arith.constant 0.000000e+00 : f32
    %14 = vector.broadcast %cst_11 : f32 to vector<8x256xf32>
    %15 = arith.maximumf %13, %14 : vector<8x256xf32>
    %16 = arith.truncf %15 : vector<8x256xf32> to vector<8x256xbf16>
    %c0_12 = arith.constant 0 : index
    %c0_13 = arith.constant 0 : index
    %17 = vector.load %arg6[%c0_12, %c0_13] : memref<256x128xbf16, #tpu.memory_space<vmem>>, vector<256x128xbf16>
    %cst_14 = arith.constant dense<0.000000e+00> : vector<8x128xf32>
    %18 = tpu.matmul %16, %17, %cst_14 {dimension_numbers = #tpu.dot_dimension_numbers<[1], [0], [0], [1], [0, 0, 1, 1], [], []>} : vector<8x256xbf16>, vector<256x128xbf16>, vector<8x128xf32> -> vector<8x128xf32>
    %c0_15 = arith.constant 0 : index
    %c0_16 = arith.constant 0 : index
    %19 = vector.load %arg7[%c0_15, %c0_16] : memref<1x128xf32, #tpu.memory_space<vmem>>, vector<1x128xf32>
    %20 = vector.broadcast %19 : vector<1x128xf32> to vector<8x128xf32>
    %21 = arith.addf %18, %20 : vector<8x128xf32>
    %cst_17 = arith.constant 0.000000e+00 : f32
    %22 = vector.broadcast %cst_17 : f32 to vector<8x128xf32>
    %23 = arith.maximumf %21, %22 : vector<8x128xf32>
    %24 = arith.truncf %23 : vector<8x128xf32> to vector<8x128xbf16>
    %c0_18 = arith.constant 0 : index
    %c0_19 = arith.constant 0 : index
    %25 = vector.load %arg8[%c0_18, %c0_19] : memref<128x128xbf16, #tpu.memory_space<vmem>>, vector<128x128xbf16>
    %cst_20 = arith.constant dense<0.000000e+00> : vector<8x128xf32>
    %26 = tpu.matmul %24, %25, %cst_20 {dimension_numbers = #tpu.dot_dimension_numbers<[1], [0], [0], [1], [0, 0, 1, 1], [], []>} : vector<8x128xbf16>, vector<128x128xbf16>, vector<8x128xf32> -> vector<8x128xf32>
    %c0_21 = arith.constant 0 : index
    %c0_22 = arith.constant 0 : index
    %27 = vector.load %arg9[%c0_21, %c0_22] : memref<1x128xf32, #tpu.memory_space<vmem>>, vector<1x128xf32>
    %28 = vector.broadcast %27 : vector<1x128xf32> to vector<8x128xf32>
    %29 = arith.addf %26, %28 : vector<8x128xf32>
    %c0_23 = arith.constant 0 : index
    %c0_24 = arith.constant 0 : index
    %30 = vector.load %arg10[%c0_23, %c0_24] : memref<8x128xf32, #tpu.memory_space<vmem>>, vector<8x128xf32>
    tpu.vector_store %arg10[%c0_23, %c0_24], %29 {strides = array<i32>} : memref<8x128xf32, #tpu.memory_space<vmem>>, vector<8x128xf32>,
    return
  }
  func.func @transform_0(%arg0: i32) -> (i32, i32) {
    %c0_i32 = arith.constant 0 : i32
    %c0_i32_0 = arith.constant 0 : i32
    return %arg0, %c0_i32 : i32, i32
  }
  func.func @transform_1(%arg0: i32) -> (i32, i32) {
    %c0_i32 = arith.constant 0 : i32
    %c0_i32_0 = arith.constant 0 : i32
    %c0_i32_1 = arith.constant 0 : i32
    return %c0_i32, %c0_i32_0 : i32, i32
  }
  func.func @transform_2(%arg0: i32) -> (i32, i32) {
    %c0_i32 = arith.constant 0 : i32
    %c0_i32_0 = arith.constant 0 : i32
    %c0_i32_1 = arith.constant 0 : i32
    return %c0_i32, %c0_i32_0 : i32, i32
  }
  func.func @transform_3(%arg0: i32) -> (i32, i32) {
    %c0_i32 = arith.constant 0 : i32
    %c0_i32_0 = arith.constant 0 : i32
    %c0_i32_1 = arith.constant 0 : i32
    return %c0_i32, %c0_i32_0 : i32, i32
  }
  func.func @transform_4(%arg0: i32) -> (i32, i32) {
    %c0_i32 = arith.constant 0 : i32
    %c0_i32_0 = arith.constant 0 : i32
    %c0_i32_1 = arith.constant 0 : i32
    return %c0_i32, %c0_i32_0 : i32, i32
  }
  func.func @transform_5(%arg0: i32) -> (i32, i32) {
    %c0_i32 = arith.constant 0 : i32
    %c0_i32_0 = arith.constant 0 : i32
    %c0_i32_1 = arith.constant 0 : i32
    return %c0_i32, %c0_i32_0 : i32, i32
  }
  func.func @transform_6(%arg0: i32) -> (i32, i32) {
    %c0_i32 = arith.constant 0 : i32
    %c0_i32_0 = arith.constant 0 : i32
    %c0_i32_1 = arith.constant 0 : i32
    return %c0_i32, %c0_i32_0 : i32, i32
  }
  func.func @transform_7(%arg0: i32) -> (i32, i32) {
    %c0_i32 = arith.constant 0 : i32
    %c0_i32_0 = arith.constant 0 : i32
    %c0_i32_1 = arith.constant 0 : i32
    return %c0_i32, %c0_i32_0 : i32, i32
  }
  func.func @transform_8(%arg0: i32) -> (i32, i32) {
    %c0_i32 = arith.constant 0 : i32
    %c0_i32_0 = arith.constant 0 : i32
    %c0_i32_1 = arith.constant 0 : i32
    return %c0_i32, %c0_i32_0 : i32, i32
  }
  func.func @transform_9(%arg0: i32) -> (i32, i32) {
    %c0_i32 = arith.constant 0 : i32
    %c0_i32_0 = arith.constant 0 : i32
    return %arg0, %c0_i32 : i32, i32
  }
}

</mosaic_0001>

<bundles_post_ra>
// kernel: mymodel_forward.1
= control target key start
LH: loop header
LB: loop body
LE: loop exit
PB: predicated region body
PF: predicated region fallthrough
CT: control target
= control target key end

     0   :  { %14 = vsyncpa [#allocation3], 0  ;;  %s3876_s0 = inlined_call_operand.vmem [shape: bf16[8,896], index: 0, kind: input, shape index: {}]   ;;  %s3877_s1 = inlined_call_operand.hbm [shape: bf16[896,512], index: 1, kind: input, shape index: {}]   ;;  %s3878_s2 = inlined_call_operand.vmem [shape: f32[1,512], index: 2, kind: input, shape index: {}]   ;;  %s3879_s3 = inlined_call_operand.vmem [shape: bf16[512,256], index: 3, kind: input, shape index: {}]   ;;  %s3880_s4 = inlined_call_operand.vmem [shape: f32[1,256], index: 4, kind: input, shape index: {}]   ;;  %s3881_s5 = inlined_call_operand.hbm [shape: bf16[256,128], index: 5, kind: input, shape index: {}]   ;;  %s3882_s6 = inlined_call_operand.vmem [shape: f32[1,128], index: 6, kind: input, shape index: {}]   ;;  %s3883_s7 = inlined_call_operand.hbm [shape: bf16[128,128], index: 7, kind: input, shape index: {}]   ;;  %s3884_s8 = inlined_call_operand.vmem [shape: f32[1,128], index: 8, kind: input, shape index: {}]   ;;  %s3885_s9 = inlined_call_operand.hbm [shape: f32[8,128], index: 9, kind: output, shape index: {}]  }
   0x1   :  { %15 = vsyncpa [#allocation6], 0 }
   0x2   :  { %16 = vsyncpa [#allocation4], 0  ;;  %s3525_s30 = smov [#allocation5]  }
   0x3   :  { %s42_s10 = sshll.u32 %s3525_s30, 4  ;;  %s43_s10 = int_to_ptr.vmem [resolvable:$true] %s42_s10 }
   0x4   :  { %s3447_s11 = scalar_lea.vmem %s43_s10, 2048  ;;  %p3452_p1 = scmp.lt.s32.totalorder %s43_s10, %s43_s10 }
   0x5   :  { %p3448_p0 = scmp.ne.s32.totalorder %s43_s10, %s3447_s11  ;;  %p3453_p2 = scmp.lt.s32.totalorder %s3447_s11, %s3447_s11 }
   0x7   :  { %p3454_p3 = por %p3453_p2, %p3452_p1 }
   0x9   :  { %p3455_p4 = pnand %p3454_p3, %p3448_p0 }
   0xb   :  { %3458 = shalt.err (!%p3455_p4)
}
   0xc   :  { %s3526_s12 = smov 64   ;;  %s3527_s13 = smov 4  }
   0xd   :  { %48 = dma.hbm_to_vmem [thread:$0]  %s3881_s5, 2048, %s43_s10, [#allocation6], %s3526_s12, %s3526_s12, %s3527_s13  }
   0xe   :  { %s3528_s16 = smov [#allocation2]  }
   0xf   :  { %s24_s17 = sshll.u32 %s3528_s16, 4  ;;  %s25_s17 = int_to_ptr.vmem [resolvable:$true] %s24_s17 }
  0x10   :  { %s3467_s18 = scalar_lea.vmem %s25_s17, 28672  ;;  %p3472_p6 = scmp.lt.s32.totalorder %s25_s17, %s25_s17 }
  0x11   :  { %p3468_p5 = scmp.ne.s32.totalorder %s25_s17, %s3467_s18  ;;  %p3473_p7 = scmp.lt.s32.totalorder %s3467_s18, %s3467_s18 }
  0x13   :  { %p3474_p8 = por %p3473_p7, %p3472_p6 }
  0x15   :  { %p3475_p9 = pnand %p3474_p8, %p3468_p5 }
  0x17   :  { %3478 = shalt.err (!%p3475_p9)
}
  0x18   :  { %s3529_s19 = smov 256   ;;  %s3530_s20 = smov 16  }
  0x19   :  { %30 = dma.hbm_to_vmem [thread:$0]  %s3877_s1, 28672, %s25_s17, [#allocation3], %s3529_s19, %s3529_s19, %s3530_s20  }
  0x1a   :  { %s3531_s23 = smov [#allocation7]  }
  0x1b   :  { %s56_s24 = sshll.u32 %s3531_s23, 4  ;;  %s57_s24 = int_to_ptr.vmem [resolvable:$true] %s56_s24 }
  0x1c   :  { %s3487_s5 = scalar_lea.vmem %s57_s24, 1024  ;;  %p3492_p11 = scmp.lt.s32.totalorder %s57_s24, %s57_s24 }
  0x1d   :  { %p3488_p10 = scmp.ne.s32.totalorder %s57_s24, %s3487_s5  ;;  %p3493_p12 = scmp.lt.s32.totalorder %s3487_s5, %s3487_s5 }
  0x1f   :  { %p3494_p13 = por %p3493_p12, %p3492_p11 }
  0x21   :  { %p3495_p0 = pnand %p3494_p13, %p3488_p10 }
  0x23   :  { %3498 = shalt.err (!%p3495_p0)
}
  0x24   :  { %62 = dma.hbm_to_vmem [thread:$0]  %s3883_s7, 1024, %s57_s24, [#allocation6], %s3526_s12, %s3526_s12, %s3527_s13  }
  0x25   :  { %3519 = dma.done.wait [#allocation3], 28672  }
  0x26   :  { %3520 = vsyncadd [#allocation3], 4294938624 }
  0x27   :  { %3521 = dma.done.wait [#allocation6], 3072  }
  0x28   :  { %3522 = vsyncadd [#allocation6], 4294964224  ;;  %v2976_v0 = vld [vmem:[#allocation2 + $0xe4] ss:$16 sps:$4 sm:$0xff]   ;;  %v2980_v2 = vld [vmem:[#allocation2 + $0xe0] ss:$16 sps:$4 sm:$0xff]  }
  0x29   :  { %v2978_v1 = vld [vmem:[#allocation2 + $0x2e4] ss:$16 sps:$4 sm:$0xff]   ;;  %1470 = vmatprep.subr.bf16.mxu0 %v2976_v0  ;;  %v2981_v3 = vld [vmem:[#allocation2 + $0x2e0] ss:$16 sps:$4 sm:$0xff]   ;;  %v76_v48 = vld [vmem:[%s3876_s0 + $0x8] sm:$0xff]  ;;  %vm3534_vm0 = vmmov 0  }
  0x2a   :  { %1511 = vmatprep.subr.bf16.mxu1 %v2978_v1  ;;  %v2982_v4 = vld [vmem:[#allocation2 + $0xc4] ss:$16 sps:$4 sm:$0xff]   ;;  %1471 = vmatpush1.bf16.msra.mxu0 %v2980_v2  ;;  %v2986_v6 = vld [vmem:[#allocation2 + $0xc0] ss:$16 sps:$4 sm:$0xff]   ;;  %v3603_v51 = vcombine.high %v76_v48, %v76_v48  ;;  %s3535_s19 = smov [#allocation8]  }
  0x2b   :  { %1512 = vmatpush1.bf16.msra.mxu1 %v2981_v3  ;;  %v2984_v5 = vld [vmem:[#allocation2 + $0x2c4] ss:$16 sps:$4 sm:$0xff]   ;;  %1472 = vmatprep.subr.bf16.mxu0 %v2982_v4  ;;  %v2987_v7 = vld [vmem:[#allocation2 + $0x2c0] ss:$16 sps:$4 sm:$0xff]   ;;  %s2583_s20 = sshll.u32 %s3535_s19, 4  ;;  %s2584_s20 = int_to_ptr.vmem [resolvable:$true] %s2583_s20 }
  0x2c   :  { %1513 = vmatprep.subr.bf16.mxu1 %v2984_v5  ;;  %v2988_v8 = vld [vmem:[#allocation2 + $0xa4] ss:$16 sps:$4 sm:$0xff]   ;;  %v2992_v10 = vld [vmem:[#allocation2 + $0xa0] ss:$16 sps:$4 sm:$0xff]   ;;  %1543 = vmatprep.mubr.bf16.mxu1 %v3603_v51  ;;  %p3504_p2 = scmp.lt.s32.totalorder %s2584_s20, %s2584_s20 }
  0x2d   :  { %v2990_v9 = vld [vmem:[#allocation2 + $0x2a4] ss:$16 sps:$4 sm:$0xff]   ;;  %v2993_v11 = vld [vmem:[#allocation2 + $0x2a0] ss:$16 sps:$4 sm:$0xff]  }
  0x2e   :  { %1473 = vmatpush1.bf16.msra.mxu0 %v2986_v6  ;;  %v2994_v12 = vld [vmem:[#allocation2 + $0x84] ss:$16 sps:$4 sm:$0xff]   ;;  %v2998_v14 = vld [vmem:[#allocation2 + $0x80] ss:$16 sps:$4 sm:$0xff]  }
  0x2f   :  { %1514 = vmatpush1.bf16.msra.mxu1 %v2987_v7  ;;  %1474 = vmatprep.subr.bf16.mxu0 %v2988_v8  ;;  %v2996_v13 = vld [vmem:[#allocation2 + $0x284] ss:$16 sps:$4 sm:$0xff]   ;;  %v2999_v15 = vld [vmem:[#allocation2 + $0x280] ss:$16 sps:$4 sm:$0xff]   ;;  %v3609_v7 = vcombine.low %v76_v48, %v76_v48  ;;  %v3136_v48 = vld [vmem:[#allocation2 + $0xcc] ss:$16 sps:$4 sm:$0xff]  }
  0x30   :  { %1515 = vmatprep.subr.bf16.mxu1 %v2990_v9  ;;  %v3000_v16 = vld [vmem:[#allocation2 + $0x64] ss:$16 sps:$4 sm:$0xff]   ;;  %v3004_v18 = vld [vmem:[#allocation2 + $0x60] ss:$16 sps:$4 sm:$0xff]  }
  0x31   :  { %v3002_v17 = vld [vmem:[#allocation2 + $0x264] ss:$16 sps:$4 sm:$0xff]   ;;  %v3005_v19 = vld [vmem:[#allocation2 + $0x260] ss:$16 sps:$4 sm:$0xff]  }
  0x32   :  { %1475 = vmatpush1.bf16.msra.mxu0 %v2992_v10  ;;  %v3006_v20 = vld [vmem:[#allocation2 + $0x44] ss:$16 sps:$4 sm:$0xff]   ;;  %v3010_v22 = vld [vmem:[#allocation2 + $0x40] ss:$16 sps:$4 sm:$0xff]  }
  0x33   :  { %1516 = vmatpush1.bf16.msra.mxu1 %v2993_v11  ;;  %1476 = vmatprep.subr.bf16.mxu0 %v2994_v12  ;;  %v3008_v21 = vld [vmem:[#allocation2 + $0x244] ss:$16 sps:$4 sm:$0xff]   ;;  %v3011_v23 = vld [vmem:[#allocation2 + $0x240] ss:$16 sps:$4 sm:$0xff]  }
  0x34   :  { %1517 = vmatprep.subr.bf16.mxu1 %v2996_v13  ;;  %v3012_v24 = vld [vmem:[#allocation2 + $0x24] ss:$16 sps:$4 sm:$0xff]   ;;  %v3016_v26 = vld [vmem:[#allocation2 + $0x20] ss:$16 sps:$4 sm:$0xff]  }
  0x35   :  { %v3014_v25 = vld [vmem:[#allocation2 + $0x224] ss:$16 sps:$4 sm:$0xff]   ;;  %v3017_v27 = vld [vmem:[#allocation2 + $0x220] ss:$16 sps:$4 sm:$0xff]  }
  0x36   :  { %1477 = vmatpush1.bf16.msra.mxu0 %v2998_v14  ;;  %v3018_v28 = vld [vmem:[#allocation2 + $0x4] ss:$16 sps:$4 sm:$0xff]   ;;  %v3022_v30 = vld [vmem:[#allocation2] ss:$16 sps:$4 sm:$0xff]  }
  0x37   :  { %1518 = vmatpush1.bf16.msra.mxu1 %v2999_v15  ;;  %1478 = vmatprep.subr.bf16.mxu0 %v3000_v16  ;;  %v3020_v29 = vld [vmem:[#allocation2 + $0x204] ss:$16 sps:$4 sm:$0xff]   ;;  %v3023_v31 = vld [vmem:[#allocation2 + $0x200] ss:$16 sps:$4 sm:$0xff]   ;;  %v3532_v16 = vmov 0  }
  0x38   :  { %1519 = vmatprep.subr.bf16.mxu1 %v3002_v17  ;;  %v3024_v32 = vld [vmem:[#allocation2 + $0x1e4] ss:$16 sps:$4 sm:$0xff]   ;;  %v3028_v34 = vld [vmem:[#allocation2 + $0x1e0] ss:$16 sps:$4 sm:$0xff]  }
  0x39   :  { %v3026_v33 = vld [vmem:[#allocation2 + $0x3e4] ss:$16 sps:$4 sm:$0xff]   ;;  %v3029_v35 = vld [vmem:[#allocation2 + $0x3e0] ss:$16 sps:$4 sm:$0xff]  }
  0x3a   :  { %1479 = vmatpush1.bf16.msra.mxu0 %v3004_v18  ;;  %v3030_v36 = vld [vmem:[#allocation2 + $0x1c4] ss:$16 sps:$4 sm:$0xff]   ;;  %v3034_v38 = vld [vmem:[#allocation2 + $0x1c0] ss:$16 sps:$4 sm:$0xff]  }
  0x3b   :  { %1520 = vmatpush1.bf16.msra.mxu1 %v3005_v19  ;;  %1480 = vmatprep.subr.bf16.mxu0 %v3006_v20  ;;  %v3032_v37 = vld [vmem:[#allocation2 + $0x3c4] ss:$16 sps:$4 sm:$0xff]   ;;  %v3035_v39 = vld [vmem:[#allocation2 + $0x3c0] ss:$16 sps:$4 sm:$0xff]  }
  0x3c   :  { %1521 = vmatprep.subr.bf16.mxu1 %v3008_v21  ;;  %v3036_v40 = vld [vmem:[#allocation2 + $0x1a4] ss:$16 sps:$4 sm:$0xff]   ;;  %v3040_v42 = vld [vmem:[#allocation2 + $0x1a0] ss:$16 sps:$4 sm:$0xff]  }
  0x3d   :  { %v3038_v41 = vld [vmem:[#allocation2 + $0x3a4] ss:$16 sps:$4 sm:$0xff]   ;;  %v3041_v43 = vld [vmem:[#allocation2 + $0x3a0] ss:$16 sps:$4 sm:$0xff]  }
  0x3e   :  { %1481 = vmatpush1.bf16.msra.mxu0 %v3010_v22  ;;  %v3042_v44 = vld [vmem:[#allocation2 + $0x184] ss:$16 sps:$4 sm:$0xff]   ;;  %v3046_v49 = vld [vmem:[#allocation2 + $0x180] ss:$16 sps:$4 sm:$0xff]  }
  0x3f   :  { %1522 = vmatpush1.bf16.msra.mxu1 %v3011_v23  ;;  %1482 = vmatprep.subr.bf16.mxu0 %v3012_v24  ;;  %v3044_v45 = vld [vmem:[#allocation2 + $0x384] ss:$16 sps:$4 sm:$0xff]   ;;  %v3047_v50 = vld [vmem:[#allocation2 + $0x380] ss:$16 sps:$4 sm:$0xff]  }
  0x40   :  { %1523 = vmatprep.subr.bf16.mxu1 %v3014_v25  ;;  %v75_v46 = vld [vmem:[%s3876_s0] sm:$0xff] }
  0x41   :  { %v3598_v47 = vcombine.high %v75_v46, %v75_v46  ;;  %v3048_v52 = vld [vmem:[#allocation2 + $0x164] ss:$16 sps:$4 sm:$0xff]   ;;  %v3052_v54 = vld [vmem:[#allocation2 + $0x160] ss:$16 sps:$4 sm:$0xff]   ;;  %v3607_v6 = vcombine.low %v75_v46, %v75_v46 }
  0x42   :  { %1483 = vmatpush1.bf16.msra.mxu0 %v3016_v26  ;;  %v3050_v53 = vld [vmem:[#allocation2 + $0x364] ss:$16 sps:$4 sm:$0xff]   ;;  %v3053_v55 = vld [vmem:[#allocation2 + $0x360] ss:$16 sps:$4 sm:$0xff]  }
  0x43   :  { %1524 = vmatpush1.bf16.msra.mxu1 %v3017_v27  ;;  %1484 = vmatprep.subr.bf16.mxu0 %v3018_v28  ;;  %v3054_v56 = vld [vmem:[#allocation2 + $0x144] ss:$16 sps:$4 sm:$0xff]   ;;  %v3058_v58 = vld [vmem:[#allocation2 + $0x140] ss:$16 sps:$4 sm:$0xff]  }
  0x44   :  { %1525 = vmatprep.subr.bf16.mxu1 %v3020_v29  ;;  %1502 = vmatprep.mubr.bf16.mxu0 %v3598_v47  ;;  %v3056_v57 = vld [vmem:[#allocation2 + $0x344] ss:$16 sps:$4 sm:$0xff]   ;;  %v3059_v59 = vld [vmem:[#allocation2 + $0x340] ss:$16 sps:$4 sm:$0xff]  }
  0x45   :  { %v3060_v60 = vld [vmem:[#allocation2 + $0x124] ss:$16 sps:$4 sm:$0xff]   ;;  %v3064_v62 = vld [vmem:[#allocation2 + $0x120] ss:$16 sps:$4 sm:$0xff]  }
  0x46   :  { %1485 = vmatpush1.bf16.msra.mxu0 %v3022_v30  ;;  %v3062_v61 = vld [vmem:[#allocation2 + $0x324] ss:$16 sps:$4 sm:$0xff]   ;;  %v3065_v63 = vld [vmem:[#allocation2 + $0x320] ss:$16 sps:$4 sm:$0xff]  }
  0x47   :  { %1526 = vmatpush1.bf16.msra.mxu1 %v3023_v31  ;;  %1486 = vmatprep.subr.bf16.mxu0 %v3024_v32  ;;  %v3066_v0 = vld [vmem:[#allocation2 + $0x104] ss:$16 sps:$4 sm:$0xff]   ;;  %v3070_v2 = vld [vmem:[#allocation2 + $0x100] ss:$16 sps:$4 sm:$0xff]  }
  0x48   :  { %1527 = vmatprep.subr.bf16.mxu1 %v3026_v33  ;;  %v3068_v1 = vld [vmem:[#allocation2 + $0x304] ss:$16 sps:$4 sm:$0xff]   ;;  %v3071_v3 = vld [vmem:[#allocation2 + $0x300] ss:$16 sps:$4 sm:$0xff]  }
  0x49   :  { %v3078_v4 = vld [vmem:[#allocation2 + $0x4e4] ss:$16 sps:$4 sm:$0xff]   ;;  %v3076_v8 = vld [vmem:[#allocation2 + $0x4e0] ss:$16 sps:$4 sm:$0xff]  }
  0x4a   :  { %1487 = vmatpush2.bf16.msra.mxu0 %v3028_v34  ;;  %v3081_v5 = vld [vmem:[#allocation2 + $0x6e4] ss:$16 sps:$4 sm:$0xff]   ;;  %v3079_v9 = vld [vmem:[#allocation2 + $0x6e0] ss:$16 sps:$4 sm:$0xff]  }
  0x4b   :  { %1528 = vmatpush2.bf16.msra.mxu1 %v3029_v35  ;;  %1488 = vmatprep.subr.bf16.mxu0 %v3030_v36  ;;  %v3084_v10 = vld [vmem:[#allocation2 + $0x4c4] ss:$16 sps:$4 sm:$0xff]   ;;  %v3082_v12 = vld [vmem:[#allocation2 + $0x4c0] ss:$16 sps:$4 sm:$0xff]  }
  0x4c   :  { %1529 = vmatprep.subr.bf16.mxu1 %v3032_v37  ;;  %v3087_v11 = vld [vmem:[#allocation2 + $0x6c4] ss:$16 sps:$4 sm:$0xff]   ;;  %v3085_v13 = vld [vmem:[#allocation2 + $0x6c0] ss:$16 sps:$4 sm:$0xff]  }
  0x4d   :  { %v3090_v14 = vld [vmem:[#allocation2 + $0x4a4] ss:$16 sps:$4 sm:$0xff]   ;;  %v3088_v17 = vld [vmem:[#allocation2 + $0x4a0] ss:$16 sps:$4 sm:$0xff]  }
  0x4e   :  { %1489 = vmatpush2.bf16.msra.mxu0 %v3034_v38  ;;  %v3093_v15 = vld [vmem:[#allocation2 + $0x6a4] ss:$16 sps:$4 sm:$0xff]   ;;  %v3091_v18 = vld [vmem:[#allocation2 + $0x6a0] ss:$16 sps:$4 sm:$0xff]  }
  0x4f   :  { %1530 = vmatpush2.bf16.msra.mxu1 %v3035_v39  ;;  %1490 = vmatprep.subr.bf16.mxu0 %v3036_v40  ;;  %v3096_v19 = vld [vmem:[#allocation2 + $0x484] ss:$16 sps:$4 sm:$0xff]   ;;  %v3094_v21 = vld [vmem:[#allocation2 + $0x480] ss:$16 sps:$4 sm:$0xff]  }
  0x50   :  { %1531 = vmatprep.subr.bf16.mxu1 %v3038_v41  ;;  %v3099_v20 = vld [vmem:[#allocation2 + $0x684] ss:$16 sps:$4 sm:$0xff]   ;;  %v3097_v22 = vld [vmem:[#allocation2 + $0x680] ss:$16 sps:$4 sm:$0xff]  }
  0x51   :  { %v3102_v23 = vld [vmem:[#allocation2 + $0x464] ss:$16 sps:$4 sm:$0xff]   ;;  %v3100_v25 = vld [vmem:[#allocation2 + $0x460] ss:$16 sps:$4 sm:$0xff]  }
  0x52   :  { %1491 = vmatpush2.bf16.msra.mxu0 %v3040_v42  ;;  %v3105_v24 = vld [vmem:[#allocation2 + $0x664] ss:$16 sps:$4 sm:$0xff]   ;;  %v3103_v26 = vld [vmem:[#allocation2 + $0x660] ss:$16 sps:$4 sm:$0xff]   ;;  %v3130_v42 = vld [vmem:[#allocation2 + $0xec] ss:$16 sps:$4 sm:$0xff]  }
  0x53   :  { %1532 = vmatpush2.bf16.msra.mxu1 %v3041_v43  ;;  %1492 = vmatprep.subr.bf16.mxu0 %v3042_v44  ;;  %v3108_v27 = vld [vmem:[#allocation2 + $0x444] ss:$16 sps:$4 sm:$0xff]   ;;  %v3106_v29 = vld [vmem:[#allocation2 + $0x440] ss:$16 sps:$4 sm:$0xff]   ;;  %v3627_v44 = vld [vmem:[%s3876_s0 + $0x18] ss:$0 sps:$4 sm:$0xff]  }
  0x54   :  { %1533 = vmatprep.subr.bf16.mxu1 %v3044_v45  ;;  %v3111_v28 = vld [vmem:[#allocation2 + $0x644] ss:$16 sps:$4 sm:$0xff]   ;;  %v3109_v30 = vld [vmem:[#allocation2 + $0x640] ss:$16 sps:$4 sm:$0xff]   ;;  %v3128_v45 = vld [vmem:[#allocation2 + $0xe8] ss:$16 sps:$4 sm:$0xff]  }
  0x55   :  { %v3114_v31 = vld [vmem:[#allocation2 + $0x424] ss:$16 sps:$4 sm:$0xff]   ;;  %v3112_v34 = vld [vmem:[#allocation2 + $0x420] ss:$16 sps:$4 sm:$0xff]  }
  0x56   :  { %1493 = vmatpush2.bf16.msra.mxu0 %v3046_v49  ;;  %v3117_v32 = vld [vmem:[#allocation2 + $0x624] ss:$16 sps:$4 sm:$0xff]   ;;  %v3115_v36 = vld [vmem:[#allocation2 + $0x620] ss:$16 sps:$4 sm:$0xff]  }
  0x57   :  { %1534 = vmatpush2.bf16.msra.mxu1 %v3047_v50  ;;  %1494 = vmatprep.subr.bf16.mxu0 %v3048_v52  ;;  %v3617_v33 = vld [vmem:[%s3876_s0 + $0x10] sm:$0xff]  ;;  %v3134_v50 = vld [vmem:[#allocation2 + $0xc8] ss:$16 sps:$4 sm:$0xff]  }
  0x58   :  { %1535 = vmatprep.subr.bf16.mxu1 %v3050_v53  ;;  %v3621_v35 = vcombine.high %v3617_v33, %v3617_v33  ;;  %v3120_v37 = vld [vmem:[#allocation2 + $0x404] ss:$16 sps:$4 sm:$0xff]   ;;  %v3118_v39 = vld [vmem:[#allocation2 + $0x400] ss:$16 sps:$4 sm:$0xff]   ;;  %v3142_v53 = vld [vmem:[#allocation2 + $0xac] ss:$16 sps:$4 sm:$0xff]  }
  0x59   :  { %v3123_v38 = vld [vmem:[#allocation2 + $0x604] ss:$16 sps:$4 sm:$0xff]   ;;  %v3121_v40 = vld [vmem:[#allocation2 + $0x600] ss:$16 sps:$4 sm:$0xff]  }
  0x5a   :  { %1495 = vmatpush2.bf16.msra.mxu0 %v3052_v54  ;;  %v3126_v41 = vld [vmem:[#allocation2 + $0x5e4] ss:$16 sps:$4 sm:$0xff]   ;;  %v3124_v43 = vld [vmem:[#allocation2 + $0x5e0] ss:$16 sps:$4 sm:$0xff]  }
  0x5b   :  { %1536 = vmatpush2.bf16.msra.mxu1 %v3053_v55  ;;  %1496 = vmatprep.subr.bf16.mxu0 %v3054_v56  ;;  %v3133_v46 = vld [vmem:[#allocation2 + $0x5c4] ss:$16 sps:$4 sm:$0xff]   ;;  %v3131_v49 = vld [vmem:[#allocation2 + $0x5c0] ss:$16 sps:$4 sm:$0xff]   ;;  %v3140_v55 = vld [vmem:[#allocation2 + $0xa8] ss:$16 sps:$4 sm:$0xff]  }
  0x5c   :  { %1537 = vmatprep.subr.bf16.mxu1 %v3056_v57  ;;  %v3139_v52 = vld [vmem:[#allocation2 + $0x5a4] ss:$16 sps:$4 sm:$0xff]   ;;  %v3137_v54 = vld [vmem:[#allocation2 + $0x5a0] ss:$16 sps:$4 sm:$0xff]   ;;  %v3148_v57 = vld [vmem:[#allocation2 + $0x8c] ss:$16 sps:$4 sm:$0xff]  }
  0x5d   :  { %v3145_v56 = vld [vmem:[#allocation2 + $0x584] ss:$16 sps:$4 sm:$0xff]  }
  0x5e   :  { %1497 = vmatpush2.bf16.msra.mxu0 %v3058_v58  ;;  %v3143_v58 = vld [vmem:[#allocation2 + $0x580] ss:$16 sps:$4 sm:$0xff]  }
  0x5f   :  { %1538 = vmatpush2.bf16.msra.mxu1 %v3059_v59  ;;  %1498 = vmatprep.subr.bf16.mxu0 %v3060_v60  ;;  %v3146_v59 = vld [vmem:[#allocation2 + $0x88] ss:$16 sps:$4 sm:$0xff]   ;;  %v3151_v60 = vld [vmem:[#allocation2 + $0x564] ss:$16 sps:$4 sm:$0xff]  }
  0x60   :  { %1539 = vmatprep.subr.bf16.mxu1 %v3062_v61  ;;  %v3154_v61 = vld [vmem:[#allocation2 + $0x6c] ss:$16 sps:$4 sm:$0xff]  }
  0x62   :  { %1499 = vmatpush2.bf16.msra.mxu0 %v3064_v62  ;;  %v3149_v62 = vld [vmem:[#allocation2 + $0x560] ss:$16 sps:$4 sm:$0xff]  }
  0x63   :  { %1540 = vmatpush2.bf16.msra.mxu1 %v3065_v63  ;;  %1500 = vmatprep.subr.bf16.mxu0 %v3066_v0  ;;  %v3157_v63 = vld [vmem:[#allocation2 + $0x544] ss:$16 sps:$4 sm:$0xff]   ;;  %v3160_v0 = vld [vmem:[#allocation2 + $0x4c] ss:$16 sps:$4 sm:$0xff]  }
  0x64   :  { %1541 = vmatprep.subr.bf16.mxu1 %v3068_v1  ;;  %v3155_v1 = vld [vmem:[#allocation2 + $0x540] ss:$16 sps:$4 sm:$0xff]  }
  0x66   :  { %1501 = vmatpush2.bf16.msra.mxu0 %v3070_v2  ;;  %v3158_v2 = vld [vmem:[#allocation2 + $0x48] ss:$16 sps:$4 sm:$0xff]  }
  0x67   :  { %1542 = vmatpush2.bf16.msra.mxu1 %v3071_v3  ;;  %1552 = vmatprep.subr.bf16.mxu0 %v3078_v4  ;;  %v3163_v3 = vld [vmem:[#allocation2 + $0x524] ss:$16 sps:$4 sm:$0xff]   ;;  %v3166_v4 = vld [vmem:[#allocation2 + $0x2c] ss:$16 sps:$4 sm:$0xff]  }
  0x68   :  { %1593 = vmatprep.subr.bf16.mxu1 %v3081_v5  ;;  %v3161_v5 = vld [vmem:[#allocation2 + $0x520] ss:$16 sps:$4 sm:$0xff]  }
  0x69   :  { %1503 = vmatmul.mubr.bf16.vlgmr.msra.gmra.mxu0 %v3607_v6 }
  0x6a   :  { %1544 = vmatmul.mubr.bf16.vlgmr.msra.gmra.mxu1 %v3609_v7  ;;  %1553 = vmatpush1.bf16.msra.mxu0 %v3076_v8  ;;  %v3164_v8 = vld [vmem:[#allocation2 + $0x28] ss:$16 sps:$4 sm:$0xff]  }
  0x6b   :  { %1594 = vmatpush1.bf16.msra.mxu1 %v3079_v9  ;;  %1554 = vmatprep.subr.bf16.mxu0 %v3084_v10  ;;  %v3169_v9 = vld [vmem:[#allocation2 + $0x504] ss:$16 sps:$4 sm:$0xff]   ;;  %v3172_v10 = vld [vmem:[#allocation2 + $0xc] ss:$16 sps:$4 sm:$0xff]  }
  0x6c   :  { %1595 = vmatprep.subr.bf16.mxu1 %v3087_v11  ;;  %1625 = vmatprep.mubr.bf16.mxu1 %v3532_v16  ;;  %v3167_v11 = vld [vmem:[#allocation2 + $0x500] ss:$16 sps:$4 sm:$0xff]  }
  0x6d   :  { %1584 = vmatprep.mubr.bf16.mxu0 %v3621_v35 }
  0x6e   :  { %1555 = vmatpush1.bf16.msra.mxu0 %v3082_v12  ;;  %v3170_v12 = vld [vmem:[#allocation2 + $0x8] ss:$16 sps:$4 sm:$0xff]  }
  0x6f   :  { %1596 = vmatpush1.bf16.msra.mxu1 %v3085_v13  ;;  %1556 = vmatprep.subr.bf16.mxu0 %v3090_v14  ;;  %v3177_v13 = vld [vmem:[#allocation2 + $0x1ec] ss:$16 sps:$4 sm:$0xff]  }
  0x70   :  { %1597 = vmatprep.subr.bf16.mxu1 %v3093_v15  ;;  %v3180_v14 = vld [vmem:[#allocation2 + $0x2ec] ss:$16 sps:$4 sm:$0xff]   ;;  %v3633_v15 = vcombine.low %v3617_v33, %v3617_v33  ;;  %v3199_v33 = vld [vmem:[#allocation2 + $0x168] ss:$16 sps:$4 sm:$0xff]  }
  0x72   :  { %1557 = vmatpush1.bf16.msra.mxu0 %v3088_v17  ;;  %v3175_v17 = vld [vmem:[#allocation2 + $0x1e8] ss:$16 sps:$4 sm:$0xff]  }
  0x73   :  { %1598 = vmatpush1.bf16.msra.mxu1 %v3091_v18  ;;  %1558 = vmatprep.subr.bf16.mxu0 %v3096_v19  ;;  %v3178_v18 = vld [vmem:[#allocation2 + $0x2e8] ss:$16 sps:$4 sm:$0xff]   ;;  %v3183_v19 = vld [vmem:[#allocation2 + $0x1cc] ss:$16 sps:$4 sm:$0xff]  }
  0x74   :  { %1599 = vmatprep.subr.bf16.mxu1 %v3099_v20  ;;  %v3186_v20 = vld [vmem:[#allocation2 + $0x2cc] ss:$16 sps:$4 sm:$0xff]  }
  0x76   :  { %1559 = vmatpush1.bf16.msra.mxu0 %v3094_v21  ;;  %v3181_v21 = vld [vmem:[#allocation2 + $0x1c8] ss:$16 sps:$4 sm:$0xff]  }
  0x77   :  { %1600 = vmatpush1.bf16.msra.mxu1 %v3097_v22  ;;  %1560 = vmatprep.subr.bf16.mxu0 %v3102_v23  ;;  %v3184_v22 = vld [vmem:[#allocation2 + $0x2c8] ss:$16 sps:$4 sm:$0xff]   ;;  %v3189_v23 = vld [vmem:[#allocation2 + $0x1ac] ss:$16 sps:$4 sm:$0xff]  }
  0x78   :  { %1601 = vmatprep.subr.bf16.mxu1 %v3105_v24  ;;  %v3192_v24 = vld [vmem:[#allocation2 + $0x2ac] ss:$16 sps:$4 sm:$0xff]  }
  0x7a   :  { %1561 = vmatpush1.bf16.msra.mxu0 %v3100_v25  ;;  %v3187_v25 = vld [vmem:[#allocation2 + $0x1a8] ss:$16 sps:$4 sm:$0xff]  }
  0x7b   :  { %1602 = vmatpush1.bf16.msra.mxu1 %v3103_v26  ;;  %1562 = vmatprep.subr.bf16.mxu0 %v3108_v27  ;;  %v3190_v26 = vld [vmem:[#allocation2 + $0x2a8] ss:$16 sps:$4 sm:$0xff]   ;;  %v3195_v27 = vld [vmem:[#allocation2 + $0x18c] ss:$16 sps:$4 sm:$0xff]  }
  0x7c   :  { %1603 = vmatprep.subr.bf16.mxu1 %v3111_v28  ;;  %v3198_v28 = vld [vmem:[#allocation2 + $0x28c] ss:$16 sps:$4 sm:$0xff]  }
  0x7e   :  { %1563 = vmatpush1.bf16.msra.mxu0 %v3106_v29  ;;  %v3193_v29 = vld [vmem:[#allocation2 + $0x188] ss:$16 sps:$4 sm:$0xff]  }
  0x7f   :  { %1604 = vmatpush1.bf16.msra.mxu1 %v3109_v30  ;;  %1564 = vmatprep.subr.bf16.mxu0 %v3114_v31  ;;  %v3196_v30 = vld [vmem:[#allocation2 + $0x288] ss:$16 sps:$4 sm:$0xff]   ;;  %v3201_v31 = vld [vmem:[#allocation2 + $0x16c] ss:$16 sps:$4 sm:$0xff]  }
  0x80   :  { %1605 = vmatprep.subr.bf16.mxu1 %v3117_v32  ;;  %v3204_v32 = vld [vmem:[#allocation2 + $0x26c] ss:$16 sps:$4 sm:$0xff]  }
  0x82   :  { %1565 = vmatpush1.bf16.msra.mxu0 %v3112_v34  ;;  %v3207_v34 = vld [vmem:[#allocation2 + $0x14c] ss:$16 sps:$4 sm:$0xff]  }
  0x83   :  { %1606 = vmatpush1.bf16.msra.mxu1 %v3115_v36  ;;  %1566 = vmatprep.subr.bf16.mxu0 %v3120_v37  ;;  %v3210_v36 = vld [vmem:[#allocation2 + $0x24c] ss:$16 sps:$4 sm:$0xff]   ;;  %v3205_v37 = vld [vmem:[#allocation2 + $0x148] ss:$16 sps:$4 sm:$0xff]  }
  0x84   :  { %1607 = vmatprep.subr.bf16.mxu1 %v3123_v38  ;;  %v3208_v38 = vld [vmem:[#allocation2 + $0x248] ss:$16 sps:$4 sm:$0xff]  }
  0x86   :  { %1567 = vmatpush1.bf16.msra.mxu0 %v3118_v39  ;;  %v3213_v39 = vld [vmem:[#allocation2 + $0x12c] ss:$16 sps:$4 sm:$0xff]  }
  0x87   :  { %1608 = vmatpush1.bf16.msra.mxu1 %v3121_v40  ;;  %1568 = vmatprep.subr.bf16.mxu0 %v3126_v41  ;;  %v3216_v40 = vld [vmem:[#allocation2 + $0x22c] ss:$16 sps:$4 sm:$0xff]   ;;  %v3211_v41 = vld [vmem:[#allocation2 + $0x128] ss:$16 sps:$4 sm:$0xff]  }
  0x88   :  { %1634 = vmatprep.subr.bf16.mxu1 %v3130_v42  ;;  %v3214_v42 = vld [vmem:[#allocation2 + $0x228] ss:$16 sps:$4 sm:$0xff]  }
  0x8a   :  { %1626 = vmatmul.mubr.bf16.vlgmr.msra.gmra.mxu1 %v3627_v44  ;;  %1569 = vmatpush2.bf16.msra.mxu0 %v3124_v43  ;;  %v3219_v43 = vld [vmem:[#allocation2 + $0x10c] ss:$16 sps:$4 sm:$0xff]  }
  0x8b   :  { %1635 = vmatpush1.bf16.msra.mxu1 %v3128_v45  ;;  %1570 = vmatprep.subr.bf16.mxu0 %v3133_v46  ;;  %v3222_v45 = vld [vmem:[#allocation2 + $0x20c] ss:$16 sps:$4 sm:$0xff]   ;;  %v3217_v46 = vld [vmem:[#allocation2 + $0x108] ss:$16 sps:$4 sm:$0xff]  }
  0x8c   :  { %1636 = vmatprep.subr.bf16.mxu1 %v3136_v48  ;;  %1666 = vmatprep.mubr.bf16.mxu1 %v3598_v47  ;;  %v3152_v47 = vld [vmem:[#allocation2 + $0x68] ss:$16 sps:$4 sm:$0xff]  }
  0x8d   :  { %v3220_v48 = vld [vmem:[#allocation2 + $0x208] ss:$16 sps:$4 sm:$0xff]  }
  0x8e   :  { %1571 = vmatpush2.bf16.msra.mxu0 %v3131_v49  ;;  %v3225_v49 = vld [vmem:[#allocation2 + $0x3ec] ss:$16 sps:$4 sm:$0xff]  }
  0x8f   :  { %1637 = vmatpush1.bf16.msra.mxu1 %v3134_v50  ;;  %1572 = vmatprep.subr.bf16.mxu0 %v3139_v52  ;;  %v3228_v50 = vld [vmem:[#allocation2 + $0x4ec] ss:$16 sps:$4 sm:$0xff]   ;;  %v3223_v52 = vld [vmem:[#allocation2 + $0x3e8] ss:$16 sps:$4 sm:$0xff]  }
  0x90   :  { %1638 = vmatprep.subr.bf16.mxu1 %v3142_v53  ;;  %v3226_v53 = vld [vmem:[#allocation2 + $0x4e8] ss:$16 sps:$4 sm:$0xff]  }
  0x92   :  { %1573 = vmatpush2.bf16.msra.mxu0 %v3137_v54  ;;  %v3231_v54 = vld [vmem:[#allocation2 + $0x3cc] ss:$16 sps:$4 sm:$0xff]  }
  0x93   :  { %1639 = vmatpush1.bf16.msra.mxu1 %v3140_v55  ;;  %1574 = vmatprep.subr.bf16.mxu0 %v3145_v56  ;;  %v3234_v55 = vld [vmem:[#allocation2 + $0x4cc] ss:$16 sps:$4 sm:$0xff]   ;;  %v3229_v56 = vld [vmem:[#allocation2 + $0x3c8] ss:$16 sps:$4 sm:$0xff]  }
  0x94   :  { %1640 = vmatprep.subr.bf16.mxu1 %v3148_v57  ;;  %v3232_v57 = vld [vmem:[#allocation2 + $0x4c8] ss:$16 sps:$4 sm:$0xff]  }
  0x96   :  { %1575 = vmatpush2.bf16.msra.mxu0 %v3143_v58  ;;  %v3237_v58 = vld [vmem:[#allocation2 + $0x3ac] ss:$16 sps:$4 sm:$0xff]  }
  0x97   :  { %1641 = vmatpush1.bf16.msra.mxu1 %v3146_v59  ;;  %1576 = vmatprep.subr.bf16.mxu0 %v3151_v60  ;;  %v3240_v59 = vld [vmem:[#allocation2 + $0x4ac] ss:$16 sps:$4 sm:$0xff]   ;;  %v3235_v60 = vld [vmem:[#allocation2 + $0x3a8] ss:$16 sps:$4 sm:$0xff]  }
  0x98   :  { %1642 = vmatprep.subr.bf16.mxu1 %v3154_v61  ;;  %v3238_v61 = vld [vmem:[#allocation2 + $0x4a8] ss:$16 sps:$4 sm:$0xff]  }
  0x9a   :  { %1577 = vmatpush2.bf16.msra.mxu0 %v3149_v62  ;;  %v3243_v62 = vld [vmem:[#allocation2 + $0x38c] ss:$16 sps:$4 sm:$0xff]  }
  0x9b   :  { %1643 = vmatpush1.bf16.msra.mxu1 %v3152_v47  ;;  %1578 = vmatprep.subr.bf16.mxu0 %v3157_v63  ;;  %v3246_v47 = vld [vmem:[#allocation2 + $0x48c] ss:$16 sps:$4 sm:$0xff]   ;;  %v3241_v63 = vld [vmem:[#allocation2 + $0x388] ss:$16 sps:$4 sm:$0xff]  }
  0x9c   :  { %1644 = vmatprep.subr.bf16.mxu1 %v3160_v0  ;;  %v3249_v0 = vld [vmem:[#allocation2 + $0x36c] ss:$16 sps:$4 sm:$0xff]  }
  0x9e   :  { %1579 = vmatpush2.bf16.msra.mxu0 %v3155_v1  ;;  %v3252_v1 = vld [vmem:[#allocation2 + $0x46c] ss:$16 sps:$4 sm:$0xff]  }
  0x9f   :  { %1645 = vmatpush1.bf16.msra.mxu1 %v3158_v2  ;;  %1580 = vmatprep.subr.bf16.mxu0 %v3163_v3  ;;  %v3247_v2 = vld [vmem:[#allocation2 + $0x368] ss:$16 sps:$4 sm:$0xff]  }
  0xa0   :  { %1646 = vmatprep.subr.bf16.mxu1 %v3166_v4  ;;  %v3250_v3 = vld [vmem:[#allocation2 + $0x468] ss:$16 sps:$4 sm:$0xff]   ;;  %v3255_v4 = vld [vmem:[#allocation2 + $0x34c] ss:$16 sps:$4 sm:$0xff]  }
  0xa2   :  { %1581 = vmatpush2.bf16.msra.mxu0 %v3161_v5  ;;  %v3258_v5 = vld [vmem:[#allocation2 + $0x44c] ss:$16 sps:$4 sm:$0xff]  }
  0xa3   :  { %1647 = vmatpush1.bf16.msra.mxu1 %v3164_v8  ;;  %1582 = vmatprep.subr.bf16.mxu0 %v3169_v9  ;;  %v3256_v8 = vld [vmem:[#allocation2 + $0x448] ss:$16 sps:$4 sm:$0xff]   ;;  %v3261_v9 = vld [vmem:[#allocation2 + $0x32c] ss:$16 sps:$4 sm:$0xff]  }
  0xa4   :  { %1648 = vmatprep.subr.bf16.mxu1 %v3172_v10  ;;  %v3264_v10 = vld [vmem:[#allocation2 + $0x42c] ss:$16 sps:$4 sm:$0xff]  }
  0xa6   :  { %1583 = vmatpush2.bf16.msra.mxu0 %v3167_v11  ;;  %v3259_v11 = vld [vmem:[#allocation2 + $0x328] ss:$16 sps:$4 sm:$0xff]  }
  0xa7   :  { %1649 = vmatpush1.bf16.msra.mxu1 %v3170_v12  ;;  %1675 = vmatprep.subr.bf16.mxu0 %v3180_v14  ;;  %v3262_v12 = vld [vmem:[#allocation2 + $0x428] ss:$16 sps:$4 sm:$0xff]   ;;  %v3270_v14 = vld [vmem:[#allocation2 + $0x40c] ss:$16 sps:$4 sm:$0xff]  }
  0xa8   :  { %1650 = vmatprep.subr.bf16.mxu1 %v3177_v13  ;;  %v3267_v13 = vld [vmem:[#allocation2 + $0x30c] ss:$16 sps:$4 sm:$0xff]  }
  0xa9   :  { %1585 = vmatmul.mubr.bf16.vlgmr.msra.gmra.mxu0 %v3633_v15 }
  0xaa   :  { %1676 = vmatpush1.bf16.msra.mxu0 %v3178_v18  ;;  %1707 = vmatprep.mubr.bf16.mxu0 %v3603_v51  ;;  %v3202_v51 = vld [vmem:[#allocation2 + $0x268] ss:$16 sps:$4 sm:$0xff]  }
  0xab   :  { %1651 = vmatpush2.bf16.msra.mxu1 %v3175_v17  ;;  %1677 = vmatprep.subr.bf16.mxu0 %v3186_v20  ;;  %v3265_v17 = vld [vmem:[#allocation2 + $0x308] ss:$16 sps:$4 sm:$0xff]   ;;  %v3276_v20 = vld [vmem:[#allocation2 + $0x6ec] ss:$16 sps:$4 sm:$0xff]  }
  0xac   :  { %1652 = vmatprep.subr.bf16.mxu1 %v3183_v19  ;;  %v3268_v18 = vld [vmem:[#allocation2 + $0x408] ss:$16 sps:$4 sm:$0xff]   ;;  %v3273_v19 = vld [vmem:[#allocation2 + $0x5ec] ss:$16 sps:$4 sm:$0xff]  }
  0xae   :  { %1678 = vmatpush1.bf16.msra.mxu0 %v3184_v22  ;;  %v3274_v22 = vld [vmem:[#allocation2 + $0x6e8] ss:$16 sps:$4 sm:$0xff]  }
  0xaf   :  { %1653 = vmatpush2.bf16.msra.mxu1 %v3181_v21  ;;  %1679 = vmatprep.subr.bf16.mxu0 %v3192_v24  ;;  %v3271_v21 = vld [vmem:[#allocation2 + $0x5e8] ss:$16 sps:$4 sm:$0xff]   ;;  %v3282_v24 = vld [vmem:[#allocation2 + $0x6cc] ss:$16 sps:$4 sm:$0xff]  }
  0xb0   :  { %1654 = vmatprep.subr.bf16.mxu1 %v3189_v23  ;;  %v3279_v23 = vld [vmem:[#allocation2 + $0x5cc] ss:$16 sps:$4 sm:$0xff]  }
  0xb2   :  { %1680 = vmatpush1.bf16.msra.mxu0 %v3190_v26  ;;  %v3280_v26 = vld [vmem:[#allocation2 + $0x6c8] ss:$16 sps:$4 sm:$0xff]  }
  0xb3   :  { %1655 = vmatpush2.bf16.msra.mxu1 %v3187_v25  ;;  %1681 = vmatprep.subr.bf16.mxu0 %v3198_v28  ;;  %v3277_v25 = vld [vmem:[#allocation2 + $0x5c8] ss:$16 sps:$4 sm:$0xff]   ;;  %v3288_v28 = vld [vmem:[#allocation2 + $0x6ac] ss:$16 sps:$4 sm:$0xff]  }
  0xb4   :  { %1656 = vmatprep.subr.bf16.mxu1 %v3195_v27  ;;  %v3285_v27 = vld [vmem:[#allocation2 + $0x5ac] ss:$16 sps:$4 sm:$0xff]  }
  0xb6   :  { %1682 = vmatpush1.bf16.msra.mxu0 %v3196_v30  ;;  %v3286_v30 = vld [vmem:[#allocation2 + $0x6a8] ss:$16 sps:$4 sm:$0xff]  }
  0xb7   :  { %1657 = vmatpush2.bf16.msra.mxu1 %v3193_v29  ;;  %1683 = vmatprep.subr.bf16.mxu0 %v3204_v32  ;;  %v3283_v29 = vld [vmem:[#allocation2 + $0x5a8] ss:$16 sps:$4 sm:$0xff]   ;;  %v3294_v32 = vld [vmem:[#allocation2 + $0x68c] ss:$16 sps:$4 sm:$0xff]  }
  0xb8   :  { %1658 = vmatprep.subr.bf16.mxu1 %v3201_v31  ;;  %v3291_v31 = vld [vmem:[#allocation2 + $0x58c] ss:$16 sps:$4 sm:$0xff]  }
  0xba   :  { %1684 = vmatpush1.bf16.msra.mxu0 %v3202_v51  ;;  %v3297_v51 = vld [vmem:[#allocation2 + $0x56c] ss:$16 sps:$4 sm:$0xff]  }
  0xbb   :  { %1659 = vmatpush2.bf16.msra.mxu1 %v3199_v33  ;;  %1685 = vmatprep.subr.bf16.mxu0 %v3210_v36  ;;  %v3289_v33 = vld [vmem:[#allocation2 + $0x588] ss:$16 sps:$4 sm:$0xff]  }
  0xbc   :  { %1660 = vmatprep.subr.bf16.mxu1 %v3207_v34  ;;  %v3300_v34 = vld [vmem:[#allocation2 + $0x66c] ss:$16 sps:$4 sm:$0xff]   ;;  %v3295_v36 = vld [vmem:[#allocation2 + $0x568] ss:$16 sps:$4 sm:$0xff]  }
  0xbe   :  { %1686 = vmatpush1.bf16.msra.mxu0 %v3208_v38  ;;  %v3306_v38 = vld [vmem:[#allocation2 + $0x64c] ss:$16 sps:$4 sm:$0xff]  }
  0xbf   :  { %1661 = vmatpush2.bf16.msra.mxu1 %v3205_v37  ;;  %1687 = vmatprep.subr.bf16.mxu0 %v3216_v40  ;;  %v3303_v37 = vld [vmem:[#allocation2 + $0x54c] ss:$16 sps:$4 sm:$0xff]   ;;  %v3304_v40 = vld [vmem:[#allocation2 + $0x648] ss:$16 sps:$4 sm:$0xff]  }
  0xc0   :  { %1662 = vmatprep.subr.bf16.mxu1 %v3213_v39  ;;  %v3301_v39 = vld [vmem:[#allocation2 + $0x548] ss:$16 sps:$4 sm:$0xff]  }
  0xc2   :  { %1688 = vmatpush1.bf16.msra.mxu0 %v3214_v42  ;;  %v3312_v42 = vld [vmem:[#allocation2 + $0x62c] ss:$16 sps:$4 sm:$0xff]  }
  0xc3   :  { %1663 = vmatpush2.bf16.msra.mxu1 %v3211_v41  ;;  %1689 = vmatprep.subr.bf16.mxu0 %v3222_v45  ;;  %v3309_v41 = vld [vmem:[#allocation2 + $0x52c] ss:$16 sps:$4 sm:$0xff]   ;;  %v3310_v45 = vld [vmem:[#allocation2 + $0x628] ss:$16 sps:$4 sm:$0xff]  }
  0xc4   :  { %1664 = vmatprep.subr.bf16.mxu1 %v3219_v43  ;;  %v3307_v43 = vld [vmem:[#allocation2 + $0x528] ss:$16 sps:$4 sm:$0xff]  }
  0xc6   :  { %1690 = vmatpush1.bf16.msra.mxu0 %v3220_v48  ;;  %v3318_v48 = vld [vmem:[#allocation2 + $0x60c] ss:$16 sps:$4 sm:$0xff]  }
  0xc7   :  { %1665 = vmatpush2.bf16.msra.mxu1 %v3217_v46  ;;  %1691 = vmatprep.subr.bf16.mxu0 %v3225_v49  ;;  %v3315_v46 = vld [vmem:[#allocation2 + $0x50c] ss:$16 sps:$4 sm:$0xff]   ;;  %v3313_v49 = vld [vmem:[#allocation2 + $0x508] ss:$16 sps:$4 sm:$0xff]  }
  0xc8   :  { %1716 = vmatprep.subr.bf16.mxu1 %v3228_v50  ;;  %v3316_v50 = vld [vmem:[#allocation2 + $0x608] ss:$16 sps:$4 sm:$0xff]  }
  0xca   :  { %1667 = vmatmul.mubr.bf16.vlgmr.msra.gmra.mxu1 %v3607_v6  ;;  %1692 = vmatpush2.bf16.msra.mxu0 %v3223_v52  ;;  %v3244_v6 = vld [vmem:[#allocation2 + $0x488] ss:$16 sps:$4 sm:$0xff]   ;;  %v3321_v52 = vld [vmem:[%s3879_s3 + $0x74] ss:$8 sps:$4 sm:$0xff]  }
  0xcb   :  { %1717 = vmatpush1.bf16.msra.mxu1 %v3226_v53  ;;  %1693 = vmatprep.subr.bf16.mxu0 %v3231_v54  ;;  %v3319_v53 = vld [vmem:[%s3879_s3 + $0x70] ss:$8 sps:$4 sm:$0xff]   ;;  %v3324_v54 = vld [vmem:[%s3879_s3 + $0x64] ss:$8 sps:$4 sm:$0xff]  }
  0xcc   :  { %1718 = vmatprep.subr.bf16.mxu1 %v3234_v55  ;;  %1748 = vmatprep.mubr.bf16.mxu1 %v3621_v35  ;;  %v3253_v35 = vld [vmem:[#allocation2 + $0x348] ss:$16 sps:$4 sm:$0xff]  }
  0xcd   :  { %v3322_v55 = vld [vmem:[%s3879_s3 + $0x60] ss:$8 sps:$4 sm:$0xff]  }
  0xce   :  { %1694 = vmatpush2.bf16.msra.mxu0 %v3229_v56  ;;  %v3327_v56 = vld [vmem:[%s3879_s3 + $0x54] ss:$8 sps:$4 sm:$0xff]  }
  0xcf   :  { %1719 = vmatpush1.bf16.msra.mxu1 %v3232_v57  ;;  %1695 = vmatprep.subr.bf16.mxu0 %v3237_v58  ;;  %v3325_v57 = vld [vmem:[%s3879_s3 + $0x50] ss:$8 sps:$4 sm:$0xff]   ;;  %v3369_v58 = vld [vmem:[%s3879_s3 + $0x174] ss:$8 sps:$4 sm:$0xff]  }
  0xd0   :  { %1720 = vmatprep.subr.bf16.mxu1 %v3240_v59  ;;  %v3372_v59 = vld [vmem:[%s3879_s3 + $0x164] ss:$8 sps:$4 sm:$0xff]  }
  0xd2   :  { %1696 = vmatpush2.bf16.msra.mxu0 %v3235_v60  ;;  %v3328_v60 = vld [vmem:[%s3879_s3 + $0x40] ss:$8 sps:$4 sm:$0xff]  }
  0xd3   :  { %1721 = vmatpush1.bf16.msra.mxu1 %v3238_v61  ;;  %1697 = vmatprep.subr.bf16.mxu0 %v3243_v62  ;;  %v3370_v61 = vld [vmem:[%s3879_s3 + $0x160] ss:$8 sps:$4 sm:$0xff]   ;;  %v3333_v62 = vld [vmem:[%s3879_s3 + $0x34] ss:$8 sps:$4 sm:$0xff]  }
  0xd4   :  { %1722 = vmatprep.subr.bf16.mxu1 %v3246_v47  ;;  %v3375_v47 = vld [vmem:[%s3879_s3 + $0x154] ss:$8 sps:$4 sm:$0xff]  }
  0xd6   :  { %1698 = vmatpush2.bf16.msra.mxu0 %v3241_v63  ;;  %v3331_v63 = vld [vmem:[%s3879_s3 + $0x30] ss:$8 sps:$4 sm:$0xff]  }
  0xd7   :  { %1723 = vmatpush1.bf16.msra.mxu1 %v3244_v6  ;;  %1699 = vmatprep.subr.bf16.mxu0 %v3249_v0  ;;  %v3373_v6 = vld [vmem:[%s3879_s3 + $0x150] ss:$8 sps:$4 sm:$0xff]   ;;  %v3336_v0 = vld [vmem:[%s3879_s3 + $0x24] ss:$8 sps:$4 sm:$0xff]  }
  0xd8   :  { %1724 = vmatprep.subr.bf16.mxu1 %v3252_v1  ;;  %v3378_v1 = vld [vmem:[%s3879_s3 + $0x144] ss:$8 sps:$4 sm:$0xff]  }
  0xda   :  { %1700 = vmatpush2.bf16.msra.mxu0 %v3247_v2  ;;  %v3334_v2 = vld [vmem:[%s3879_s3 + $0x20] ss:$8 sps:$4 sm:$0xff]  }
  0xdb   :  { %1725 = vmatpush1.bf16.msra.mxu1 %v3250_v3  ;;  %1701 = vmatprep.subr.bf16.mxu0 %v3255_v4  ;;  %v3376_v3 = vld [vmem:[%s3879_s3 + $0x140] ss:$8 sps:$4 sm:$0xff]   ;;  %v3339_v4 = vld [vmem:[%s3879_s3 + $0x14] ss:$8 sps:$4 sm:$0xff]  }
  0xdc   :  { %1726 = vmatprep.subr.bf16.mxu1 %v3258_v5  ;;  %v3381_v5 = vld [vmem:[%s3879_s3 + $0x134] ss:$8 sps:$4 sm:$0xff]  }
  0xde   :  { %1702 = vmatpush2.bf16.msra.mxu0 %v3253_v35  ;;  %v3337_v35 = vld [vmem:[%s3879_s3 + $0x10] ss:$8 sps:$4 sm:$0xff]  }
  0xdf   :  { %1727 = vmatpush1.bf16.msra.mxu1 %v3256_v8  ;;  %1703 = vmatprep.subr.bf16.mxu0 %v3261_v9  ;;  %v3379_v8 = vld [vmem:[%s3879_s3 + $0x130] ss:$8 sps:$4 sm:$0xff]   ;;  %v3342_v9 = vld [vmem:[%s3879_s3 + $0x4] ss:$8 sps:$4 sm:$0xff]  }
  0xe0   :  { %1728 = vmatprep.subr.bf16.mxu1 %v3264_v10  ;;  %v3340_v10 = vld [vmem:[%s3879_s3] ss:$8 sps:$4 sm:$0xff]  }
  0xe2   :  { %1704 = vmatpush2.bf16.msra.mxu0 %v3259_v11  ;;  %v3345_v11 = vld [vmem:[%s3879_s3 + $0xf4] ss:$8 sps:$4 sm:$0xff]  }
  0xe3   :  { %1729 = vmatpush1.bf16.msra.mxu1 %v3262_v12  ;;  %1705 = vmatprep.subr.bf16.mxu0 %v3267_v13  ;;  %v3343_v12 = vld [vmem:[%s3879_s3 + $0xf0] ss:$8 sps:$4 sm:$0xff]   ;;  %v3348_v13 = vld [vmem:[%s3879_s3 + $0xe4] ss:$8 sps:$4 sm:$0xff]  }
  0xe4   :  { %1730 = vmatprep.subr.bf16.mxu1 %v3270_v14  ;;  %v3384_v14 = vld [vmem:[%s3879_s3 + $0x124] ss:$8 sps:$4 sm:$0xff]  }
  0xe6   :  { %1706 = vmatpush2.bf16.msra.mxu0 %v3265_v17  ;;  %v3382_v17 = vld [vmem:[%s3879_s3 + $0x120] ss:$8 sps:$4 sm:$0xff]  }
  0xe7   :  { %1731 = vmatpush1.bf16.msra.mxu1 %v3268_v18  ;;  %1757 = vmatprep.subr.bf16.mxu0 %v3276_v20  ;;  %v3346_v20 = vld [vmem:[%s3879_s3 + $0xe0] ss:$8 sps:$4 sm:$0xff]  }
  0xe8   :  { %1732 = vmatprep.subr.bf16.mxu1 %v3273_v19 }
  0xe9   :  { %1708 = vmatmul.mubr.bf16.vlgmr.msra.gmra.mxu0 %v3609_v7  ;;  %v3292_v7 = vld [vmem:[#allocation2 + $0x688] ss:$16 sps:$4 sm:$0xff]  }
  0xea   :  { %1758 = vmatpush1.bf16.msra.mxu0 %v3274_v22  ;;  %1789 = vmatprep.mubr.bf16.mxu0 %v3532_v16  ;;  %v3298_v16 = vld [vmem:[#allocation2 + $0x668] ss:$16 sps:$4 sm:$0xff]  }
  0xeb   :  { %1733 = vmatpush2.bf16.msra.mxu1 %v3271_v21  ;;  %1759 = vmatprep.subr.bf16.mxu0 %v3282_v24  ;;  %v3387_v24 = vld [vmem:[%s3879_s3 + $0x114] ss:$8 sps:$4 sm:$0xff]  }
  0xec   :  { %1734 = vmatprep.subr.bf16.mxu1 %v3279_v23  ;;  %v3351_v23 = vld [vmem:[%s3879_s3 + $0xd4] ss:$8 sps:$4 sm:$0xff]  }
  0xee   :  { %1760 = vmatpush1.bf16.msra.mxu0 %v3280_v26 }
  0xef   :  { %1735 = vmatpush2.bf16.msra.mxu1 %v3277_v25  ;;  %1761 = vmatprep.subr.bf16.mxu0 %v3288_v28  ;;  %v3385_v25 = vld [vmem:[%s3879_s3 + $0x110] ss:$8 sps:$4 sm:$0xff]  }
  0xf0   :  { %1736 = vmatprep.subr.bf16.mxu1 %v3285_v27  ;;  %v3349_v28 = vld [vmem:[%s3879_s3 + $0xd0] ss:$8 sps:$4 sm:$0xff]  }
  0xf2   :  { %1762 = vmatpush1.bf16.msra.mxu0 %v3286_v30 }
  0xf3   :  { %1737 = vmatpush2.bf16.msra.mxu1 %v3283_v29  ;;  %1763 = vmatprep.subr.bf16.mxu0 %v3294_v32  ;;  %v3388_v32 = vld [vmem:[%s3879_s3 + $0x100] ss:$8 sps:$4 sm:$0xff]  }
  0xf4   :  { %1738 = vmatprep.subr.bf16.mxu1 %v3291_v31  ;;  %v3354_v31 = vld [vmem:[%s3879_s3 + $0xc4] ss:$8 sps:$4 sm:$0xff]  }
  0xf6   :  { %1764 = vmatpush1.bf16.msra.mxu0 %v3292_v7  ;;  %v3393_v7 = vld [vmem:[%s3879_s3 + $0x1f4] ss:$8 sps:$4 sm:$0xff]  }
  0xf7   :  { %1739 = vmatpush2.bf16.msra.mxu1 %v3289_v33  ;;  %1765 = vmatprep.subr.bf16.mxu0 %v3300_v34  ;;  %v3390_v33 = vld [vmem:[%s3879_s3 + $0x104] ss:$8 sps:$4 sm:$0xff]   ;;  %v3391_v34 = vld [vmem:[%s3879_s3 + $0x1f0] ss:$8 sps:$4 sm:$0xff]  }
  0xf8   :  { %1740 = vmatprep.subr.bf16.mxu1 %v3297_v51  ;;  %v3352_v51 = vld [vmem:[%s3879_s3 + $0xc0] ss:$8 sps:$4 sm:$0xff]  }
  0xfa   :  { %1766 = vmatpush1.bf16.msra.mxu0 %v3298_v16  ;;  %v3396_v16 = vld [vmem:[%s3879_s3 + $0x1e4] ss:$8 sps:$4 sm:$0xff]  }
  0xfb   :  { %1741 = vmatpush2.bf16.msra.mxu1 %v3295_v36  ;;  %1767 = vmatprep.subr.bf16.mxu0 %v3306_v38  ;;  %v3357_v36 = vld [vmem:[%s3879_s3 + $0xb4] ss:$8 sps:$4 sm:$0xff]   ;;  %v3394_v38 = vld [vmem:[%s3879_s3 + $0x1e0] ss:$8 sps:$4 sm:$0xff]  }
  0xfc   :  { %1742 = vmatprep.subr.bf16.mxu1 %v3303_v37  ;;  %v3355_v37 = vld [vmem:[%s3879_s3 + $0xb0] ss:$8 sps:$4 sm:$0xff]  }
  0xfe   :  { %1768 = vmatpush1.bf16.msra.mxu0 %v3304_v40  ;;  %v3399_v40 = vld [vmem:[%s3879_s3 + $0x1d4] ss:$8 sps:$4 sm:$0xff]  }
  0xff   :  { %1743 = vmatpush2.bf16.msra.mxu1 %v3301_v39  ;;  %1769 = vmatprep.subr.bf16.mxu0 %v3312_v42  ;;  %v3360_v39 = vld [vmem:[%s3879_s3 + $0xa4] ss:$8 sps:$4 sm:$0xff]   ;;  %v3397_v42 = vld [vmem:[%s3879_s3 + $0x1d0] ss:$8 sps:$4 sm:$0xff]  }
 0x100   :  { %1744 = vmatprep.subr.bf16.mxu1 %v3309_v41  ;;  %v3358_v41 = vld [vmem:[%s3879_s3 + $0xa0] ss:$8 sps:$4 sm:$0xff]  }
 0x102   :  { %1770 = vmatpush1.bf16.msra.mxu0 %v3310_v45  ;;  %v3402_v45 = vld [vmem:[%s3879_s3 + $0x1c4] ss:$8 sps:$4 sm:$0xff]  }
 0x103   :  { %1745 = vmatpush2.bf16.msra.mxu1 %v3307_v43  ;;  %1771 = vmatprep.subr.bf16.mxu0 %v3318_v48  ;;  %v3363_v43 = vld [vmem:[%s3879_s3 + $0x94] ss:$8 sps:$4 sm:$0xff]   ;;  %v3400_v48 = vld [vmem:[%s3879_s3 + $0x1c0] ss:$8 sps:$4 sm:$0xff]  }
 0x104   :  { %1746 = vmatprep.subr.bf16.mxu1 %v3315_v46  ;;  %v3361_v46 = vld [vmem:[%s3879_s3 + $0x90] ss:$8 sps:$4 sm:$0xff]  }
 0x106   :  { %1772 = vmatpush1.bf16.msra.mxu0 %v3316_v50  ;;  %v3405_v50 = vld [vmem:[%s3879_s3 + $0x1b4] ss:$8 sps:$4 sm:$0xff]  }
 0x107   :  { %1747 = vmatpush2.bf16.msra.mxu1 %v3313_v49  ;;  %2202 = vmatprep.subr.bf16.mxu0 %v3321_v52  ;;  %v3366_v49 = vld [vmem:[%s3879_s3 + $0x84] ss:$8 sps:$4 sm:$0xff]   ;;  %v3364_v52 = vld [vmem:[%s3879_s3 + $0x80] ss:$8 sps:$4 sm:$0xff]  }
 0x108   :  { %2243 = vmatprep.subr.bf16.mxu1 %v3369_v58 }
 0x109   :  { %1790 = vmatmul.mubr.bf16.vlgmr.msra.gmra.mxu0 %v3627_v44  ;;  %v3330_v44 = vld [vmem:[%s3879_s3 + $0x44] ss:$8 sps:$4 sm:$0xff]  }
 0x10a   :  { %1749 = vmatmul.mubr.bf16.vlgmr.msra.gmra.mxu1 %v3633_v15  ;;  %2203 = vmatpush1.bf16.msra.mxu0 %v3319_v53  ;;  %v3367_v15 = vld [vmem:[%s3879_s3 + $0x170] ss:$8 sps:$4 sm:$0xff]  }
 0x10b   :  { %2204 = vmatprep.subr.bf16.mxu0 %v3324_v54  ;;  %2244 = vmatpush1.bf16.msra.mxu1 %v3367_v15  ;;  %v3403_v53 = vld [vmem:[%s3879_s3 + $0x1b0] ss:$8 sps:$4 sm:$0xff]   ;;  %v3408_v54 = vld [vmem:[%s3879_s3 + $0x1a4] ss:$8 sps:$4 sm:$0xff]  }
 0x10c   :  { %2245 = vmatprep.subr.bf16.mxu1 %v3372_v59  ;;  %v3409_v15 = vld [vmem:[%s3879_s3 + $0x190] ss:$8 sps:$4 sm:$0xff]  }
 0x10e   :  { %2205 = vmatpush1.bf16.msra.mxu0 %v3322_v55  ;;  %v3406_v55 = vld [vmem:[%s3879_s3 + $0x1a0] ss:$8 sps:$4 sm:$0xff]  }
 0x10f   :  { %2206 = vmatprep.subr.bf16.mxu0 %v3327_v56  ;;  %2246 = vmatpush1.bf16.msra.mxu1 %v3370_v61  ;;  %v3412_v61 = vld [vmem:[%s3879_s3 + $0x180] ss:$8 sps:$4 sm:$0xff]  }
 0x110   :  { %2247 = vmatprep.subr.bf16.mxu1 %v3375_v47 }
 0x112   :  { %2207 = vmatpush1.bf16.msra.mxu0 %v3325_v57 }
 0x113   :  { %2208 = vmatprep.subr.bf16.mxu0 %v3330_v44  ;;  %2248 = vmatpush1.bf16.msra.mxu1 %v3373_v6  ;;  %v3411_v44 = vld [vmem:[%s3879_s3 + $0x194] ss:$8 sps:$4 sm:$0xff]   ;;  %v303_v6 = vld [vmem:[%s3878_s2] sm:$0xf] }
 0x114   :  { %2249 = vmatprep.subr.bf16.mxu1 %v3378_v1 }
 0x116   :  { %2209 = vmatpush1.bf16.msra.mxu0 %v3328_v60  ;;  %v3414_v60 = vld [vmem:[%s3879_s3 + $0x184] ss:$8 sps:$4 sm:$0xff]  }
 0x117   :  { %2210 = vmatprep.subr.bf16.mxu0 %v3333_v62  ;;  %2250 = vmatpush1.bf16.msra.mxu1 %v3376_v3  ;;  %v305_v62 = vlaneseq }
 0x118   :  { %2251 = vmatprep.subr.bf16.mxu1 %v3381_v5 }
 0x119   :  { %v3843_v47 = vshrl.u32 %v305_v62, 7 }
 0x11a   :  { %2211 = vmatpush1.bf16.msra.mxu0 %v3331_v63 }
 0x11b   :  { %2212 = vmatprep.subr.bf16.mxu0 %v3336_v0  ;;  %2252 = vmatpush1.bf16.msra.mxu1 %v3379_v8  ;;  %v307_v63 = vsub.s32 0, %v3843_v47  ;;  %v311_v0 = vsub.s32 1, %v3843_v47 }
 0x11c   :  { %2253 = vmatprep.subr.bf16.mxu1 %v3384_v14 }
 0x11d   :  { %v308_v1 = vrot.slane %v303_v6, %v307_v63 }
 0x11e   :  { %2213 = vmatpush1.bf16.msra.mxu0 %v3334_v2  ;;  %v312_v2 = vrot.slane %v303_v6, %v311_v0 }
 0x11f   :  { %2214 = vmatprep.subr.bf16.mxu0 %v3339_v4  ;;  %2254 = vmatpush1.bf16.msra.mxu1 %v3382_v17 }
 0x120   :  { %2255 = vmatprep.subr.bf16.mxu1 %v3387_v24 }
 0x122   :  { %2215 = vmatpush1.bf16.msra.mxu0 %v3337_v35 }
 0x123   :  { %2216 = vmatprep.subr.bf16.mxu0 %v3342_v9  ;;  %2256 = vmatpush1.bf16.msra.mxu1 %v3385_v25 }
 0x124   :  { %2257 = vmatprep.subr.bf16.mxu1 %v3390_v33  ;;  %v315_v33 = vsub.s32 2, %v3843_v47 }
 0x126   :  { %2217 = vmatpush1.bf16.msra.mxu0 %v3340_v10 }
 0x127   :  { %2218 = vmatprep.subr.bf16.mxu0 %v3345_v11  ;;  %2258 = vmatpush1.bf16.msra.mxu1 %v3388_v32  ;;  %v3417_v32 = vld [vmem:[#allocation5 + $0x70] sm:$0xff]  }
 0x128   :  { %2259 = vmatprep.subr.bf16.mxu1 %v3393_v7  ;;  %v3418_v7 = vld [vmem:[#allocation5 + $0x30] sm:$0xff]  }
 0x129   :  { %v3736_v18 = vpop.f32.mrf.mxu0 }
 0x12a   :  { %v3738_v19 = vpop.f32.mrf.mxu1  ;;  %2219 = vmatpush2.bf16.msra.mxu0 %v3343_v12  ;;  %v1505_v3 = vadd.f32 %v3736_v18, %v308_v1 }
 0x12b   :  { %v3743_v21 = vpop.f32.mrf.mxu0  ;;  %2220 = vmatprep.subr.bf16.mxu0 %v3348_v13  ;;  %2260 = vmatpush2.bf16.msra.mxu1 %v3391_v34  ;;  %v319_v34 = vsub.s32 3, %v3843_v47  ;;  %v3438_v47 = vld [vmem:[#allocation7] sm:$0xff]  }
 0x12c   :  { %v3745_v22 = vpop.f32.mrf.mxu1  ;;  %2261 = vmatprep.subr.bf16.mxu1 %v3396_v16  ;;  %v1507_v4 = vadd.f32 %v3743_v21, %v312_v2  ;;  %v1546_v5 = vadd.f32 %v3738_v19, %v1505_v3  ;;  %v3420_v16 = vld [vmem:[#allocation5 + $0x28] sm:$0xff]  }
 0x12d   :  { %v1508_v26 = vpop.f32.mrf.mxu0  ;;  %v3427_v2 = vld [vmem:[#allocation5 + $0x48] sm:$0xff]  }
 0x12e   :  { %v1549_v27 = vpop.f32.mrf.mxu1  ;;  %2221 = vmatpush2.bf16.msra.mxu0 %v3346_v20  ;;  %v1548_v8 = vadd.f32 %v3745_v22, %v1507_v4  ;;  %v3428_v3 = vld [vmem:[#allocation5 + $0x8] sm:$0xff]   ;;  %v3429_v4 = vld [vmem:[#allocation5 + $0x40] sm:$0xff]  }
 0x12f   :  { %v1509_v29 = vpop.f32.mrf.mxu0  ;;  %2222 = vmatprep.subr.bf16.mxu0 %v3351_v23  ;;  %2262 = vmatpush2.bf16.msra.mxu1 %v3394_v38  ;;  %v320_v38 = vrot.slane %v303_v6, %v319_v34 }
 0x130   :  { %v1550_v30 = vpop.f32.mrf.mxu1  ;;  %2263 = vmatprep.subr.bf16.mxu1 %v3399_v40  ;;  %v3422_v40 = vld [vmem:[#allocation5 + $0x20] sm:$0xff]  }
 0x131   :  { %v3415_v30 = vld [vmem:[#allocation5 + $0x78] sm:$0xff]  }
 0x132   :  { %2223 = vmatpush2.bf16.msra.mxu0 %v3349_v28 }
 0x133   :  { %2224 = vmatprep.subr.bf16.mxu0 %v3354_v31  ;;  %2264 = vmatpush2.bf16.msra.mxu1 %v3397_v42  ;;  %v3416_v31 = vld [vmem:[#allocation5 + $0x38] sm:$0xff]  }
 0x134   :  { %2265 = vmatprep.subr.bf16.mxu1 %v3402_v45 }
 0x136   :  { %2225 = vmatpush2.bf16.msra.mxu0 %v3352_v51  ;;  %v3419_v51 = vld [vmem:[#allocation5 + $0x68] sm:$0xff]  }
 0x137   :  { %2226 = vmatprep.subr.bf16.mxu0 %v3357_v36  ;;  %2266 = vmatpush2.bf16.msra.mxu1 %v3400_v48  ;;  %v316_v36 = vrot.slane %v303_v6, %v315_v33 }
 0x138   :  { %2267 = vmatprep.subr.bf16.mxu1 %v3405_v50  ;;  %v3424_v50 = vld [vmem:[#allocation5 + $0x18] sm:$0xff]  }
 0x13a   :  { %2227 = vmatpush2.bf16.msra.mxu0 %v3355_v37  ;;  %v3421_v37 = vld [vmem:[#allocation5 + $0x60] sm:$0xff]  }
 0x13b   :  { %2228 = vmatprep.subr.bf16.mxu0 %v3360_v39  ;;  %2268 = vmatpush2.bf16.msra.mxu1 %v3403_v53 }
 0x13c   :  { %2269 = vmatprep.subr.bf16.mxu1 %v3408_v54  ;;  %v3425_v54 = vld [vmem:[#allocation5 + $0x50] sm:$0xff]  }
 0x13e   :  { %2229 = vmatpush2.bf16.msra.mxu0 %v3358_v41  ;;  %v3423_v41 = vld [vmem:[#allocation5 + $0x58] sm:$0xff]  }
 0x13f   :  { %2230 = vmatprep.subr.bf16.mxu0 %v3363_v43  ;;  %2270 = vmatpush2.bf16.msra.mxu1 %v3406_v55 }
 0x140   :  { %2271 = vmatprep.subr.bf16.mxu1 %v3411_v44 }
 0x142   :  { %2231 = vmatpush2.bf16.msra.mxu0 %v3361_v46 }
 0x143   :  { %2232 = vmatprep.subr.bf16.mxu0 %v3366_v49  ;;  %2272 = vmatpush2.bf16.msra.mxu1 %v3409_v15 }
 0x144   :  { %2273 = vmatprep.subr.bf16.mxu1 %v3414_v60 }
 0x146   :  { %2233 = vmatpush2.bf16.msra.mxu0 %v3364_v52 }
 0x147   :  { %2274 = vmatpush2.bf16.msra.mxu1 %v3412_v61  ;;  %2914 = vmatprep.subr.bf16.mxu0 %v3415_v30 }
 0x14a   :  { %v1627_v56 = vpop.f32.mrf.mxu1 }
 0x14c   :  { %v1629_v57 = vpop.f32.mrf.mxu1 }
 0x14e   :  { %v1631_v58 = vpop.f32.mrf.mxu1 }
 0x14f   :  { %v3426_v58 = vld [vmem:[#allocation5 + $0x10] sm:$0xff]  }
 0x150   :  { %v1632_v59 = vpop.f32.mrf.mxu1 }
 0x169   :  { %v1586_v35 = vpop.f32.mrf.mxu0 }
 0x16a   :  { %v1587_v9 = vadd.f32 %v1586_v35, %v1546_v5  ;;  %v3430_v5 = vld [vmem:[#allocation5] sm:$0xff]   ;;  %v3431_v35 = vld [vmem:[#allocation7 + $0x38] sm:$0xff]  }
 0x16b   :  { %v1588_v10 = vpop.f32.mrf.mxu0 }
 0x16c   :  { %v1628_v11 = vadd.f32 %v1627_v56, %v1587_v9  ;;  %v1589_v12 = vadd.f32 %v1588_v10, %v1548_v8  ;;  %v3533_v8 = vmov 0.0   ;;  %v3432_v9 = vld [vmem:[#allocation7 + $0x30] sm:$0xff]   ;;  %v3433_v10 = vld [vmem:[#allocation7 + $0x28] sm:$0xff]  }
 0x16d   :  { %v1590_v13 = vpop.f32.mrf.mxu0  ;;  %2945 = vmatprep.subr.bf16.mxu1 %v3533_v8 }
 0x16e   :  { %v1630_v14 = vadd.f32 %v1629_v57, %v1589_v12  ;;  %v1798_v17 = vmax.f32 %v1628_v11, 0.0  ;;  %v3434_v11 = vld [vmem:[#allocation7 + $0x20] sm:$0xff]   ;;  %v3435_v12 = vld [vmem:[#allocation7 + $0x18] sm:$0xff]  }
 0x16f   :  { %v1591_v20 = vpop.f32.mrf.mxu0 }
 0x170   :  { %v1799_v23 = vmax.f32 %v1630_v14, 0.0  ;;  %v1802_v25 = vpack.c.bf16 %v1798_v17, %v1798_v17 }
 0x172   :  { %v1803_v24 = vpack.c.bf16 %v1799_v23, %v1799_v23  ;;  %v1870_v23 = vld [vmem:[%s3880_s4] sm:$0x3] }
 0x174   :  { %2234 = vmatprep.mubr.bf16.mxu0 %v1803_v24  ;;  %v1875_v24 = vrot.slane %v1870_v23, %v307_v63  ;;  %v3437_v63 = vld [vmem:[#allocation7 + $0x8] sm:$0xff]  }
 0x175   :  { %2235 = vmatmul.mubr.bf16.vlgmr.msra.gmra.mxu0 %v1802_v25  ;;  %v1879_v25 = vrot.slane %v1870_v23, %v311_v0 }
 0x176   :  { %2915 = vmatpush3.bf16.msra.mxu0 %v3416_v31 }
 0x177   :  { %2916 = vmatprep.subr.bf16.mxu0 %v3417_v32 }
 0x17a   :  { %2917 = vmatpush3.bf16.msra.mxu0 %v3418_v7  ;;  %v3436_v7 = vld [vmem:[#allocation7 + $0x10] sm:$0xff]  }
 0x17b   :  { %2918 = vmatprep.subr.bf16.mxu0 %v3419_v51  ;;  %v2888_v51 = vld [vmem:[%s3882_s6] ss:$0 sm:$0xff]  ;;  %s3499_s6 = scalar_lea.vmem %s2584_s20, 128 }
 0x17c   :  { %p3500_p1 = scmp.ne.s32.totalorder %s2584_s20, %s3499_s6  ;;  %p3505_p3 = scmp.lt.s32.totalorder %s3499_s6, %s3499_s6 }
 0x17e   :  { %2919 = vmatpush3.bf16.msra.mxu0 %v3420_v16  ;;  %p3506_p4 = por %p3505_p3, %p3504_p2 }
 0x17f   :  { %2920 = vmatprep.subr.bf16.mxu0 %v3421_v37 }
 0x180   :  { %p3507_p5 = pnand %p3506_p4, %p3500_p1 }
 0x182   :  { %2921 = vmatpush3.bf16.msra.mxu0 %v3422_v40 }
 0x183   :  { %2922 = vmatprep.subr.bf16.mxu0 %v3423_v41  ;;  %v2905_v41 = vld [vmem:[%s3884_s8] ss:$0 sm:$0xff] }
 0x186   :  { %2923 = vmatpush3.bf16.msra.mxu0 %v3424_v50 }
 0x187   :  { %2924 = vmatprep.subr.bf16.mxu0 %v3425_v54 }
 0x18a   :  { %v1668_v18 = vpop.f32.mrf.mxu1  ;;  %2925 = vmatpush3.bf16.msra.mxu0 %v3426_v58 }
 0x18b   :  { %v1669_v39 = vadd.f32 %v1668_v18, %v316_v36  ;;  %2926 = vmatprep.subr.bf16.mxu0 %v3427_v2 }
 0x18c   :  { %v1670_v21 = vpop.f32.mrf.mxu1 }
 0x18d   :  { %v1671_v42 = vadd.f32 %v1670_v21, %v320_v38 }
 0x18e   :  { %v1672_v26 = vpop.f32.mrf.mxu1  ;;  %2927 = vmatpush3.bf16.msra.mxu0 %v3428_v3 }
 0x18f   :  { %2928 = vmatprep.subr.bf16.mxu0 %v3429_v4 }
 0x190   :  { %v1673_v19 = vpop.f32.mrf.mxu1 }
 0x192   :  { %2929 = vmatpush3.bf16.msra.mxu0 %v3430_v5 }
 0x1a9   :  { %v1709_v27 = vpop.f32.mrf.mxu0 }
 0x1aa   :  { %v1710_v43 = vadd.f32 %v1709_v27, %v1669_v39 }
 0x1ab   :  { %v1711_v28 = vpop.f32.mrf.mxu0 }
 0x1ac   :  { %v1712_v48 = vadd.f32 %v1711_v28, %v1671_v42 }
 0x1ad   :  { %v1713_v22 = vpop.f32.mrf.mxu0 }
 0x1af   :  { %v1714_v29 = vpop.f32.mrf.mxu0 }
 0x1c9   :  { %v1791_v46 = vpop.f32.mrf.mxu0 }
 0x1ca   :  { %v1750_v45 = vpop.f32.mrf.mxu1 }
 0x1cb   :  { %v1751_v49 = vadd.f32 %v1750_v45, %v1710_v43  ;;  %v1793_v53 = vpop.f32.mrf.mxu0 }
 0x1cc   :  { %v1752_v52 = vpop.f32.mrf.mxu1 }
 0x1cd   :  { %v1792_v55 = vadd.f32 %v1791_v46, %v1751_v49  ;;  %v1753_v56 = vadd.f32 %v1752_v52, %v1712_v48  ;;  %v1795_v44 = vpop.f32.mrf.mxu0 }
 0x1ce   :  { %v1754_v57 = vpop.f32.mrf.mxu1 }
 0x1cf   :  { %v1794_v15 = vadd.f32 %v1793_v53, %v1753_v56  ;;  %v1800_v59 = vmax.f32 %v1792_v55, 0.0  ;;  %v1796_v61 = vpop.f32.mrf.mxu0 }
 0x1d0   :  { %v1755_v60 = vpop.f32.mrf.mxu1 }
 0x1d1   :  { %v1801_v62 = vmax.f32 %v1794_v15, 0.0  ;;  %v1804_v1 = vpack.c.bf16 %v1800_v59, %v1800_v59 }
 0x1d3   :  { %v1805_v6 = vpack.c.bf16 %v1801_v62, %v1801_v62 }
 0x1d5   :  { %2275 = vmatprep.mubr.bf16.mxu1 %v1805_v6 }
 0x1d6   :  { %2276 = vmatmul.mubr.bf16.vlgmr.msra.gmra.mxu1 %v1804_v1 }
 0x1d7   :  { %2946 = vmatpush3.bf16.msra.mxu1 %v3431_v35  ;;  %2961 = vmatprep.mubr.msk.bf16.mxu1 %vm3534_vm0, %v3533_v8 }
 0x1d8   :  { %2947 = vmatprep.subr.bf16.mxu1 %v3533_v8 }
 0x1db   :  { %2948 = vmatpush3.bf16.msra.mxu1 %v3432_v9 }
 0x1dc   :  { %2949 = vmatprep.subr.bf16.mxu1 %v3533_v8 }
 0x1df   :  { %2950 = vmatpush3.bf16.msra.mxu1 %v3433_v10 }
 0x1e0   :  { %2951 = vmatprep.subr.bf16.mxu1 %v3533_v8 }
 0x1e3   :  { %2952 = vmatpush3.bf16.msra.mxu1 %v3434_v11 }
 0x1e4   :  { %2953 = vmatprep.subr.bf16.mxu1 %v3533_v8 }
 0x1e7   :  { %2954 = vmatpush3.bf16.msra.mxu1 %v3435_v12 }
 0x1e8   :  { %2955 = vmatprep.subr.bf16.mxu1 %v3533_v8 }
 0x1eb   :  { %2956 = vmatpush3.bf16.msra.mxu1 %v3436_v7 }
 0x1ec   :  { %2957 = vmatprep.subr.bf16.mxu1 %v3533_v8 }
 0x1ef   :  { %2958 = vmatpush3.bf16.msra.mxu1 %v3437_v63 }
 0x1f0   :  { %2959 = vmatprep.subr.bf16.mxu1 %v3533_v8 }
 0x1f3   :  { %2960 = vmatpush3.bf16.msra.mxu1 %v3438_v47 }
 0x235   :  { %v2236_v13 = vpop.f32.mrf.mxu0 }
 0x236   :  { %v2237_v18 = vadd.f32 %v2236_v13, %v1875_v24 }
 0x237   :  { %v2238_v14 = vpop.f32.mrf.mxu0 }
 0x238   :  { %v2239_v26 = vadd.f32 %v2238_v14, %v1879_v25 }
 0x239   :  { %v2240_v17 = vpop.f32.mrf.mxu0 }
 0x23b   :  { %v2241_v20 = vpop.f32.mrf.mxu0 }
 0x296   :  { %v2277_v21 = vpop.f32.mrf.mxu1 }
 0x297   :  { %v2278_v19 = vadd.f32 %v2277_v21, %v2237_v18 }
 0x298   :  { %v2279_v27 = vpop.f32.mrf.mxu1 }
 0x299   :  { %v2280_v28 = vadd.f32 %v2279_v27, %v2239_v26  ;;  %v2284_v22 = vmax.f32 %v2278_v19, 0.0 }
 0x29a   :  { %v2281_v29 = vpop.f32.mrf.mxu1 }
 0x29b   :  { %v2285_v30 = vmax.f32 %v2280_v28, 0.0  ;;  %v2286_v33 = vpack.c.bf16 %v2284_v22, %v2284_v22 }
 0x29c   :  { %v2282_v31 = vpop.f32.mrf.mxu1 }
 0x29d   :  { %v2287_v32 = vpack.c.bf16 %v2285_v30, %v2285_v30 }
 0x29f   :  { %2455 = vmatprep.mubr.bf16.mxu0 %v2287_v32 }
 0x2a0   :  { %2456 = vmatmul.mubr.bf16.vlgmr.msra.gmra.mxu0 %v2286_v33 }
 0x360   :  { %v2930_v0 = vpop.f32.mrf.mxu0 }
 0x362   :  { %v2931_v34 = vpop.f32.mrf.mxu0 }
 0x363   :  { %v2932_v36 = vadd.f32 %v2931_v34, %v2930_v0 }
 0x364   :  { %v2933_v16 = vpop.f32.mrf.mxu0 }
 0x365   :  { %v2458_v37 = vadd.f32 %v2932_v36, %v2888_v51 }
 0x366   :  { %v2934_v38 = vpop.f32.mrf.mxu0 }
 0x367   :  { %v2463_v39 = vmax.f32 %v2458_v37, 0.0 }
 0x369   :  { %v2464_v40 = vpack.c.bf16 %v2463_v39, %v2463_v39 }
 0x36b   :  { %2962 = vmatmul.mubr.bf16.vlgmr.msra.gmra.mxu1 %v2464_v40 }
 0x42b   :  { %v2570_v42 = vpop.f32.mrf.mxu1 }
 0x42c   :  { %v2571_v43 = vadd.f32 %v2905_v41, %v2570_v42 }
 0x42d   :  { %v2963_v45 = vpop.f32.mrf.mxu1 }
 0x42e   :  { %2576 = vst [vmem:[#allocation8] sm:$0xff] %v2571_v43 }
 0x42f   :  { %v2573_v46 = vpop.f32.mrf.mxu1 }
 0x430   :  { %3510 = shalt.err (!%p3507_p5)
}
 0x431   :  { %2586 = dma.vmem_to_hbm [thread:$0]  %s2584_s20, 128, %s3885_s9, [#allocation4]   ;;  %v2964_v48 = vpop.f32.mrf.mxu1 }
 0x432   :  { %3523 = dma.done.wait [#allocation4], 128  }
 0x433   :  { %3524 = vsyncadd [#allocation4], 4294967168 }
 0x434   :  { %2590 = vsyncpa [#allocation3], 1 }
 0x435   :  { %2591 = vsyncpa [#allocation6], 1 }
 0x436   :  { %2592 = vsyncpa [#allocation4], 1 }

</bundles_post_ra>
